<compile_context>
chip_gen: v7x
topology: tpu7x:2x2x1
jax: 0.10.0
libtpu: 0.0.40
codegen_flags: <defaults>
</compile_context>

<pallas_src>
import math
import functools

import numpy as np
import jax
import jax.numpy as jnp
from jax import lax
from jax.experimental import pallas as pl
from jax.experimental.pallas import tpu as pltpu


NEG_INF = -1e30  # large negative instead of -inf (avoids inf arithmetic)


# ----------------------------- in-kernel helpers -----------------------------

def _layer_norm(x, gamma, beta, eps=1e-6):
    # PyTorch nn.LayerNorm semantics (biased variance), eps=1e-6 per the module.
    mean = jnp.mean(x, axis=-1, keepdims=True)
    var = jnp.mean((x - mean) ** 2, axis=-1, keepdims=True)
    return (x - mean) * lax.rsqrt(var + eps) * gamma + beta


# ------------------------------ fused Pallas kernel ---------------------------

def fused_encoder_kernel(
        bias_ref, idx_ref, x_in_ref, emb_ref, pos_ref, ln0g_ref, ln0b_ref,
        wqkv_ref, wo_ref,
        ln1g_ref, ln1b_ref, w1_ref, b1_ref, w2_ref, b2_ref,
        ln2g_ref, ln2b_ref,
        o_ref,
        heads_scr,
        *, n_layers, n_head, d_k, d_v, n_types):
    H_dk = n_head * d_k
    H_dv = n_head * d_v
    scale = 1.0 / math.sqrt(d_k)

    # ---- embedding lookup (VPU selects, no MXU) + pos-enc + input LayerNorm --
    idx = idx_ref[...]                                     # (BS, 1) int32
    emb = jnp.zeros(x_in_ref.shape, jnp.float32)
    for t in range(n_types):
        emb = jnp.where(idx == t, emb_ref[t:t + 1, :], emb)
    # dropout: eval mode -> identity
    x = _layer_norm(emb + x_in_ref[...] + pos_ref[...],
                    ln0g_ref[...], ln0b_ref[...])          # (BS, D) f32

    # Precomputed additive block-diagonal bias (0 within a sample, -1e30 across).
    bias = bias_ref[...]                                   # (BS, BS) f32

    # ---- static loop over post-norm transformer encoder layers ---------------
    for l in range(n_layers):
        x_bf = x.astype(jnp.bfloat16)

        # fused Q/K/V projection: one wide MXU call, cast result to bf16 once
        qkv = jnp.dot(x_bf, wqkv_ref[l],
                      preferred_element_type=jnp.float32)  # (BS, 2*H_dk + H_dv)
        qkv_bf = qkv.astype(jnp.bfloat16)
        q = qkv_bf[:, :H_dk]
        k = qkv_bf[:, H_dk:2 * H_dk]
        v = qkv_bf[:, 2 * H_dk:2 * H_dk + H_dv]

        # per-head attention; heads written into lane columns of a bf16 scratch
        for h in range(n_head):                            # static unroll
            qh = q[:, h * d_k:(h + 1) * d_k]
            kh = k[:, h * d_k:(h + 1) * d_k]
            vh = v[:, h * d_v:(h + 1) * d_v]
            s = lax.dot_general(qh, kh, (((1,), (1,)), ((), ())),
                                preferred_element_type=jnp.float32)
            s = s * scale + bias
            s = s - jnp.max(s, axis=-1, keepdims=True)
            p = jnp.exp(s)
            p = p / jnp.sum(p, axis=-1, keepdims=True)     # exact normalization
            head = jnp.dot(p.astype(jnp.bfloat16), vh,
                           preferred_element_type=jnp.float32)  # (BS, d_v)
            heads_scr[:, h * d_v:(h + 1) * d_v] = head.astype(jnp.bfloat16)

        # single K = H*d_v output projection (== concat(heads) @ W_o)
        attn_out = jnp.dot(heads_scr[...], wo_ref[l],
                           preferred_element_type=jnp.float32)
        x = _layer_norm(x + attn_out, ln1g_ref[l], ln1b_ref[l])

        # position-wise FFN (bias on both linears, ReLU)
        h1 = jnp.maximum(
            jnp.dot(x.astype(jnp.bfloat16), w1_ref[l],
                    preferred_element_type=jnp.float32) + b1_ref[l], 0.0)
        ffn = jnp.dot(h1.astype(jnp.bfloat16), w2_ref[l],
                      preferred_element_type=jnp.float32) + b2_ref[l]
        x = _layer_norm(x + ffn, ln2g_ref[l], ln2b_ref[l])

    o_ref[...] = x


# ------------------------------ host-side wrapper ------------------------------

def correct_pad_encoder_forward(input_array, correct_pad, params):
    B, S, D = input_array.shape
    n_layers = params["wqkv"].shape[0]
    n_head, d_k, d_v = params["n_head"], params["d_k"], params["d_v"]
    d_inner = params["w1"].shape[-1]
    n_types = params["emb_table"].shape[0]
    BS = B * S

    idx = correct_pad.reshape(BS, 1).astype(jnp.int32)
    x_in = input_array.reshape(BS, D)
    pos = jnp.tile(params["pos_table"][:S], (B, 1))        # (BS, D)

    # Additive block-diagonal attention bias, built once on the host.
    row = np.arange(BS, dtype=np.int32) // S
    bias = jnp.asarray(
        np.where(row[:, None] == row[None, :], 0.0, NEG_INF).astype(np.float32))

    def const_spec(shape):
        # whole array, resident in VMEM for the single grid step
        return pl.BlockSpec(shape, lambda i, _n=len(shape): (0,) * _n)

    kern = functools.partial(fused_encoder_kernel, n_layers=n_layers,
                             n_head=n_head, d_k=d_k, d_v=d_v, n_types=n_types)

    out = pl.pallas_call(
        kern,
        out_shape=jax.ShapeDtypeStruct((BS, D), jnp.float32),
        grid=(1,),
        in_specs=[
            const_spec((BS, BS)),                           # additive attn bias
            const_spec((BS, 1)),                            # correct_pad indices
            const_spec((BS, D)),                            # input_array (batch folded)
            const_spec((n_types, D)),                       # embedding table
            const_spec((BS, D)),                            # positional encoding
            const_spec((1, D)), const_spec((1, D)),         # input LayerNorm g/b
            const_spec((n_layers, D, 2 * n_head * d_k + n_head * d_v)),  # wqkv
            const_spec((n_layers, n_head * d_v, D)),        # wo
            const_spec((n_layers, 1, D)), const_spec((n_layers, 1, D)),  # ln1 g/b
            const_spec((n_layers, D, d_inner)),             # w1
            const_spec((n_layers, 1, d_inner)),             # b1
            const_spec((n_layers, d_inner, D)),             # w2
            const_spec((n_layers, 1, D)),                   # b2
            const_spec((n_layers, 1, D)), const_spec((n_layers, 1, D)),  # ln2 g/b
        ],
        out_specs=const_spec((BS, D)),
        scratch_shapes=[pltpu.VMEM((BS, n_head * d_v), jnp.bfloat16)],  # head concat
        compiler_params=pltpu.CompilerParams(
            dimension_semantics=("arbitrary",)),
    )(bias, idx, x_in, params["emb_table"], pos, params["ln_g"], params["ln_b"],
      params["wqkv"], params["wo"],
      params["ln1_g"], params["ln1_b"], params["w1"], params["b1"],
      params["w2"], params["b2"], params["ln2_g"], params["ln2_b"])

    return out.reshape(B, S, D)


# ------------------------------ parameter setup --------------------------------

def sinusoid_table(n_position, d_model):
    pos = np.arange(n_position, dtype=np.float64)[:, None]
    i = np.arange(d_model)
    angle = pos / np.power(10000.0, 2.0 * (i // 2) / d_model)
    table = np.zeros((n_position, d_model), dtype=np.float64)
    table[:, 0::2] = np.sin(angle[:, 0::2])
    table[:, 1::2] = np.cos(angle[:, 1::2])
    return jnp.asarray(table, dtype=jnp.float32)


def init_params(key, *, d_model, d_inner, n_head, d_k, d_v, n_layers,
                n_types, n_position=1000):
    def nrm(k, shape, scale=0.02, dtype=jnp.float32):
        return (scale * jax.random.normal(k, shape, dtype=jnp.float32)).astype(dtype)

    bf16 = jnp.bfloat16
    L = n_layers
    keys = jax.random.split(key, 9)
    # fused QKV weight stack: (L, D, H*d_k | H*d_k | H*d_v) along lanes
    wq = nrm(keys[1], (L, d_model, n_head * d_k))
    wk = nrm(keys[2], (L, d_model, n_head * d_k))
    wv = nrm(keys[3], (L, d_model, n_head * d_v))
    params = {
        "n_head": n_head, "d_k": d_k, "d_v": d_v,
        "emb_table": nrm(keys[0], (n_types, d_model), 1.0),
        "pos_table": sinusoid_table(n_position, d_model),
        "ln_g": jnp.ones((1, d_model), jnp.float32),
        "ln_b": jnp.zeros((1, d_model), jnp.float32),
        # stacked per-layer weights; matmul operands stored in bf16
        "wqkv": jnp.concatenate([wq, wk, wv], axis=-1).astype(bf16),
        "wo": nrm(keys[4], (L, n_head * d_v, d_model), dtype=bf16),
        "ln1_g": jnp.ones((L, 1, d_model), jnp.float32),
        "ln1_b": jnp.zeros((L, 1, d_model), jnp.float32),
        "w1": nrm(keys[5], (L, d_model, d_inner), dtype=bf16),
        "b1": nrm(keys[6], (L, 1, d_inner)),
        "w2": nrm(keys[7], (L, d_inner, d_model), dtype=bf16),
        "b2": nrm(keys[8], (L, 1, d_model)),
        "ln2_g": jnp.ones((L, 1, d_model), jnp.float32),
        "ln2_b": jnp.zeros((L, 1, d_model), jnp.float32),
    }
    return params


# ------------------------------------ main -------------------------------------

if __name__ == "__main__":
    B, S = 2, 8
    d_model = 128           # embedding_size == d_model
    n_head, d_k, d_v = 4, 32, 32
    d_inner = 256
    n_layers = 2
    n_types = 4             # n_type_correctness

    key = jax.random.PRNGKey(0)
    k_in, k_idx, k_par = jax.random.split(key, 3)

    input_array = jax.random.normal(k_in, (B, S, d_model), dtype=jnp.float32)
    correct_pad = jax.random.randint(k_idx, (B, S), 0, n_types, dtype=jnp.int32)

    params = init_params(k_par, d_model=d_model, d_inner=d_inner, n_head=n_head,
                         d_k=d_k, d_v=d_v, n_layers=n_layers, n_types=n_types)

    out = correct_pad_encoder_forward(input_array, correct_pad, params)
    out = jax.block_until_ready(out)
    assert out.shape == (B, S, d_model) and out.dtype == jnp.float32
    print("KERNEL_OK")
</pallas_src>

<mosaic_0001>
module attributes {stable_mosaic.version = 11 : i64} {
  func.func @fused_encoder_kernel(%arg0: i32, %arg1: memref<16x16xf32, #tpu.memory_space<vmem>>, %arg2: memref<16x1xi32, #tpu.memory_space<vmem>>, %arg3: memref<16x128xf32, #tpu.memory_space<vmem>>, %arg4: memref<4x128xf32, #tpu.memory_space<vmem>>, %arg5: memref<16x128xf32, #tpu.memory_space<vmem>>, %arg6: memref<1x128xf32, #tpu.memory_space<vmem>>, %arg7: memref<1x128xf32, #tpu.memory_space<vmem>>, %arg8: memref<2x128x384xbf16, #tpu.memory_space<vmem>>, %arg9: memref<2x128x128xbf16, #tpu.memory_space<vmem>>, %arg10: memref<2x1x128xf32, #tpu.memory_space<vmem>>, %arg11: memref<2x1x128xf32, #tpu.memory_space<vmem>>, %arg12: memref<2x128x256xbf16, #tpu.memory_space<vmem>>, %arg13: memref<2x1x256xf32, #tpu.memory_space<vmem>>, %arg14: memref<2x256x128xbf16, #tpu.memory_space<vmem>>, %arg15: memref<2x1x128xf32, #tpu.memory_space<vmem>>, %arg16: memref<2x1x128xf32, #tpu.memory_space<vmem>>, %arg17: memref<2x1x128xf32, #tpu.memory_space<vmem>>, %arg18: memref<16x128xf32, #tpu.memory_space<vmem>>, %arg19: memref<16x128xbf16, #tpu.memory_space<vmem>>) attributes {dimension_semantics = [#tpu.dimension_semantics<arbitrary>], iteration_bounds = array<i64: 1>, scalar_prefetch = 0 : i64, scratch_operands = 1 : i64, tpu.core_type = #tpu.core_type<tc>, window_params = [{pipeline_mode = #tpu.pipeline_mode<synchronous>, transform_indices = @transform_0, window_bounds = array<i64: 16, 16>}, {pipeline_mode = #tpu.pipeline_mode<synchronous>, transform_indices = @transform_1, window_bounds = array<i64: 16, 1>}, {pipeline_mode = #tpu.pipeline_mode<synchronous>, transform_indices = @transform_2, window_bounds = array<i64: 16, 128>}, {pipeline_mode = #tpu.pipeline_mode<synchronous>, transform_indices = @transform_3, window_bounds = array<i64: 4, 128>}, {pipeline_mode = #tpu.pipeline_mode<synchronous>, transform_indices = @transform_4, window_bounds = array<i64: 16, 128>}, {pipeline_mode = #tpu.pipeline_mode<synchronous>, transform_indices = @transform_5, window_bounds = array<i64: 1, 128>}, {pipeline_mode = #tpu.pipeline_mode<synchronous>, transform_indices = @transform_6, window_bounds = array<i64: 1, 128>}, {pipeline_mode = #tpu.pipeline_mode<synchronous>, transform_indices = @transform_7, window_bounds = array<i64: 2, 128, 384>}, {pipeline_mode = #tpu.pipeline_mode<synchronous>, transform_indices = @transform_8, window_bounds = array<i64: 2, 128, 128>}, {pipeline_mode = #tpu.pipeline_mode<synchronous>, transform_indices = @transform_9, window_bounds = array<i64: 2, 1, 128>}, {pipeline_mode = #tpu.pipeline_mode<synchronous>, transform_indices = @transform_10, window_bounds = array<i64: 2, 1, 128>}, {pipeline_mode = #tpu.pipeline_mode<synchronous>, transform_indices = @transform_11, window_bounds = array<i64: 2, 128, 256>}, {pipeline_mode = #tpu.pipeline_mode<synchronous>, transform_indices = @transform_12, window_bounds = array<i64: 2, 1, 256>}, {pipeline_mode = #tpu.pipeline_mode<synchronous>, transform_indices = @transform_13, window_bounds = array<i64: 2, 256, 128>}, {pipeline_mode = #tpu.pipeline_mode<synchronous>, transform_indices = @transform_14, window_bounds = array<i64: 2, 1, 128>}, {pipeline_mode = #tpu.pipeline_mode<synchronous>, transform_indices = @transform_15, window_bounds = array<i64: 2, 1, 128>}, {pipeline_mode = #tpu.pipeline_mode<synchronous>, transform_indices = @transform_16, window_bounds = array<i64: 2, 1, 128>}, {pipeline_mode = #tpu.pipeline_mode<synchronous>, transform_indices = @transform_17, window_bounds = array<i64: 16, 128>}]} {
    %c0 = arith.constant 0 : index
    %c0_0 = arith.constant 0 : index
    %0 = vector.load %arg2[%c0, %c0_0] : memref<16x1xi32, #tpu.memory_space<vmem>>, vector<16x1xi32>
    %cst = arith.constant 0.000000e+00 : f32
    %1 = vector.broadcast %cst : f32 to vector<16x128xf32>
    %c0_i32 = arith.constant 0 : i32
    %2 = vector.broadcast %c0_i32 : i32 to vector<16x1xi32>
    %3 = arith.cmpi eq, %0, %2 : vector<16x1xi32>
    %c0_1 = arith.constant 0 : index
    %c0_2 = arith.constant 0 : index
    %4 = vector.load %arg4[%c0_1, %c0_2] : memref<4x128xf32, #tpu.memory_space<vmem>>, vector<1x128xf32>
    %5 = vector.shape_cast %3 : vector<16x1xi1> to vector<16x1xi1>
    %6 = vector.broadcast %5 : vector<16x1xi1> to vector<16x128xi1>
    %7 = vector.shape_cast %4 : vector<1x128xf32> to vector<1x128xf32>
    %8 = vector.broadcast %7 : vector<1x128xf32> to vector<16x128xf32>
    %9 = arith.select %6, %8, %1 : vector<16x128xi1>, vector<16x128xf32>
    %c1_i32 = arith.constant 1 : i32
    %10 = vector.broadcast %c1_i32 : i32 to vector<16x1xi32>
    %11 = arith.cmpi eq, %0, %10 : vector<16x1xi32>
    %c1 = arith.constant 1 : index
    %c0_3 = arith.constant 0 : index
    %12 = vector.load %arg4[%c1, %c0_3] : memref<4x128xf32, #tpu.memory_space<vmem>>, vector<1x128xf32>
    %13 = vector.shape_cast %11 : vector<16x1xi1> to vector<16x1xi1>
    %14 = vector.broadcast %13 : vector<16x1xi1> to vector<16x128xi1>
    %15 = vector.shape_cast %12 : vector<1x128xf32> to vector<1x128xf32>
    %16 = vector.broadcast %15 : vector<1x128xf32> to vector<16x128xf32>
    %17 = arith.select %14, %16, %9 : vector<16x128xi1>, vector<16x128xf32>
    %c2_i32 = arith.constant 2 : i32
    %18 = vector.broadcast %c2_i32 : i32 to vector<16x1xi32>
    %19 = arith.cmpi eq, %0, %18 : vector<16x1xi32>
    %c2 = arith.constant 2 : index
    %c0_4 = arith.constant 0 : index
    %20 = vector.load %arg4[%c2, %c0_4] : memref<4x128xf32, #tpu.memory_space<vmem>>, vector<1x128xf32>
    %21 = vector.shape_cast %19 : vector<16x1xi1> to vector<16x1xi1>
    %22 = vector.broadcast %21 : vector<16x1xi1> to vector<16x128xi1>
    %23 = vector.shape_cast %20 : vector<1x128xf32> to vector<1x128xf32>
    %24 = vector.broadcast %23 : vector<1x128xf32> to vector<16x128xf32>
    %25 = arith.select %22, %24, %17 : vector<16x128xi1>, vector<16x128xf32>
    %c3_i32 = arith.constant 3 : i32
    %26 = vector.broadcast %c3_i32 : i32 to vector<16x1xi32>
    %27 = arith.cmpi eq, %0, %26 : vector<16x1xi32>
    %c3 = arith.constant 3 : index
    %c0_5 = arith.constant 0 : index
    %28 = vector.load %arg4[%c3, %c0_5] : memref<4x128xf32, #tpu.memory_space<vmem>>, vector<1x128xf32>
    %29 = vector.shape_cast %27 : vector<16x1xi1> to vector<16x1xi1>
    %30 = vector.broadcast %29 : vector<16x1xi1> to vector<16x128xi1>
    %31 = vector.shape_cast %28 : vector<1x128xf32> to vector<1x128xf32>
    %32 = vector.broadcast %31 : vector<1x128xf32> to vector<16x128xf32>
    %33 = arith.select %30, %32, %25 : vector<16x128xi1>, vector<16x128xf32>
    %c0_6 = arith.constant 0 : index
    %c0_7 = arith.constant 0 : index
    %34 = vector.load %arg3[%c0_6, %c0_7] : memref<16x128xf32, #tpu.memory_space<vmem>>, vector<16x128xf32>
    %35 = arith.addf %33, %34 : vector<16x128xf32>
    %c0_8 = arith.constant 0 : index
    %c0_9 = arith.constant 0 : index
    %36 = vector.load %arg5[%c0_8, %c0_9] : memref<16x128xf32, #tpu.memory_space<vmem>>, vector<16x128xf32>
    %37 = arith.addf %35, %36 : vector<16x128xf32>
    %c0_10 = arith.constant 0 : index
    %c0_11 = arith.constant 0 : index
    %38 = vector.load %arg6[%c0_10, %c0_11] : memref<1x128xf32, #tpu.memory_space<vmem>>, vector<1x128xf32>
    %c0_12 = arith.constant 0 : index
    %c0_13 = arith.constant 0 : index
    %39 = vector.load %arg7[%c0_12, %c0_13] : memref<1x128xf32, #tpu.memory_space<vmem>>, vector<1x128xf32>
    %cst_14 = arith.constant dense<0.000000e+00> : vector<16xf32>
    %40 = vector.multi_reduction <add>, %37, %cst_14 [1] : vector<16x128xf32> to vector<16xf32>
    %41 = vector.shape_cast %40 : vector<16xf32> to vector<16x1xf32>
    %cst_15 = arith.constant 1.280000e+02 : f32
    %42 = vector.broadcast %cst_15 : f32 to vector<16x1xf32>
    %43 = arith.divf %41, %42 : vector<16x1xf32>
    %44 = vector.broadcast %43 : vector<16x1xf32> to vector<16x128xf32>
    %45 = arith.subf %37, %44 : vector<16x128xf32>
    %46 = arith.mulf %45, %45 : vector<16x128xf32>
    %cst_16 = arith.constant dense<0.000000e+00> : vector<16xf32>
    %47 = vector.multi_reduction <add>, %46, %cst_16 [1] : vector<16x128xf32> to vector<16xf32>
    %48 = vector.shape_cast %47 : vector<16xf32> to vector<16x1xf32>
    %cst_17 = arith.constant 1.280000e+02 : f32
    %49 = vector.broadcast %cst_17 : f32 to vector<16x1xf32>
    %50 = arith.divf %48, %49 : vector<16x1xf32>
    %51 = vector.broadcast %43 : vector<16x1xf32> to vector<16x128xf32>
    %52 = arith.subf %37, %51 : vector<16x128xf32>
    %cst_18 = arith.constant 9.99999997E-7 : f32
    %53 = vector.broadcast %cst_18 : f32 to vector<16x1xf32>
    %54 = arith.addf %50, %53 : vector<16x1xf32>
    %55 = math.rsqrt %54 : vector<16x1xf32>
    %56 = vector.broadcast %55 : vector<16x1xf32> to vector<16x128xf32>
    %57 = arith.mulf %52, %56 : vector<16x128xf32>
    %58 = vector.broadcast %38 : vector<1x128xf32> to vector<16x128xf32>
    %59 = arith.mulf %57, %58 : vector<16x128xf32>
    %60 = vector.broadcast %39 : vector<1x128xf32> to vector<16x128xf32>
    %61 = arith.addf %59, %60 : vector<16x128xf32>
    %c0_19 = arith.constant 0 : index
    %c0_20 = arith.constant 0 : index
    %62 = vector.load %arg1[%c0_19, %c0_20] : memref<16x16xf32, #tpu.memory_space<vmem>>, vector<16x16xf32>
    %63 = arith.truncf %61 : vector<16x128xf32> to vector<16x128xbf16>
    %c0_21 = arith.constant 0 : index
    %c0_22 = arith.constant 0 : index
    %c0_23 = arith.constant 0 : index
    %64 = vector.load %arg8[%c0_21, %c0_22, %c0_23] : memref<2x128x384xbf16, #tpu.memory_space<vmem>>, vector<1x128x384xbf16>
    %65 = vector.shape_cast %64 : vector<1x128x384xbf16> to vector<128x384xbf16>
    %cst_24 = arith.constant dense<0.000000e+00> : vector<16x384xf32>
    %66 = tpu.matmul %63, %65, %cst_24 {dimension_numbers = #tpu.dot_dimension_numbers<[1], [0], [0], [1], [0, 0, 1, 1], [], []>} : vector<16x128xbf16>, vector<128x384xbf16>, vector<16x384xf32> -> vector<16x384xf32>
    %67 = arith.truncf %66 : vector<16x384xf32> to vector<16x384xbf16>
    %68 = vector.extract_strided_slice %67 {offsets = [0, 0], sizes = [16, 128], strides = [1, 1]} : vector<16x384xbf16> to vector<16x128xbf16>
    %69 = vector.extract_strided_slice %67 {offsets = [0, 128], sizes = [16, 128], strides = [1, 1]} : vector<16x384xbf16> to vector<16x128xbf16>
    %70 = vector.extract_strided_slice %67 {offsets = [0, 256], sizes = [16, 128], strides = [1, 1]} : vector<16x384xbf16> to vector<16x128xbf16>
    %71 = vector.extract_strided_slice %68 {offsets = [0, 0], sizes = [16, 32], strides = [1, 1]} : vector<16x128xbf16> to vector<16x32xbf16>
    %72 = vector.extract_strided_slice %69 {offsets = [0, 0], sizes = [16, 32], strides = [1, 1]} : vector<16x128xbf16> to vector<16x32xbf16>
    %73 = vector.extract_strided_slice %70 {offsets = [0, 0], sizes = [16, 32], strides = [1, 1]} : vector<16x128xbf16> to vector<16x32xbf16>
    %cst_25 = arith.constant dense<0.000000e+00> : vector<16x16xf32>
    %74 = tpu.matmul %71, %72, %cst_25 {dimension_numbers = #tpu.dot_dimension_numbers<[1], [1], [0], [0], [0, 0, 1, 0], [], []>} : vector<16x32xbf16>, vector<16x32xbf16>, vector<16x16xf32> -> vector<16x16xf32>
    %cst_26 = arith.constant 0.176776692 : f32
    %75 = vector.broadcast %cst_26 : f32 to vector<16x16xf32>
    %76 = arith.mulf %74, %75 : vector<16x16xf32>
    %77 = arith.addf %76, %62 : vector<16x16xf32>
    %cst_27 = arith.constant dense<0xFF800000> : vector<16xf32>
    %78 = vector.multi_reduction <maximumf>, %77, %cst_27 [1] : vector<16x16xf32> to vector<16xf32>
    %79 = vector.shape_cast %78 : vector<16xf32> to vector<16x1xf32>
    %80 = vector.broadcast %79 : vector<16x1xf32> to vector<16x16xf32>
    %81 = arith.subf %77, %80 : vector<16x16xf32>
    %82 = math.exp %81 : vector<16x16xf32>
    %cst_28 = arith.constant dense<0.000000e+00> : vector<16xf32>
    %83 = vector.multi_reduction <add>, %82, %cst_28 [1] : vector<16x16xf32> to vector<16xf32>
    %84 = vector.shape_cast %83 : vector<16xf32> to vector<16x1xf32>
    %85 = vector.broadcast %84 : vector<16x1xf32> to vector<16x16xf32>
    %86 = arith.divf %82, %85 : vector<16x16xf32>
    %87 = arith.truncf %86 : vector<16x16xf32> to vector<16x16xbf16>
    %cst_29 = arith.constant dense<0.000000e+00> : vector<16x32xf32>
    %88 = tpu.matmul %87, %73, %cst_29 {dimension_numbers = #tpu.dot_dimension_numbers<[1], [0], [0], [1], [0, 0, 1, 1], [], []>} : vector<16x16xbf16>, vector<16x32xbf16>, vector<16x32xf32> -> vector<16x32xf32>
    %89 = arith.truncf %88 : vector<16x32xf32> to vector<16x32xbf16>
    %c0_30 = arith.constant 0 : index
    %c0_31 = arith.constant 0 : index
    %90 = vector.load %arg19[%c0_30, %c0_31] : memref<16x128xbf16, #tpu.memory_space<vmem>>, vector<16x32xbf16>
    tpu.vector_store %arg19[%c0_30, %c0_31], %89 {strides = array<i32>} : memref<16x128xbf16, #tpu.memory_space<vmem>>, vector<16x32xbf16>,
    %91 = vector.extract_strided_slice %68 {offsets = [0, 32], sizes = [16, 32], strides = [1, 1]} : vector<16x128xbf16> to vector<16x32xbf16>
    %92 = vector.extract_strided_slice %69 {offsets = [0, 32], sizes = [16, 32], strides = [1, 1]} : vector<16x128xbf16> to vector<16x32xbf16>
    %93 = vector.extract_strided_slice %70 {offsets = [0, 32], sizes = [16, 32], strides = [1, 1]} : vector<16x128xbf16> to vector<16x32xbf16>
    %cst_32 = arith.constant dense<0.000000e+00> : vector<16x16xf32>
    %94 = tpu.matmul %91, %92, %cst_32 {dimension_numbers = #tpu.dot_dimension_numbers<[1], [1], [0], [0], [0, 0, 1, 0], [], []>} : vector<16x32xbf16>, vector<16x32xbf16>, vector<16x16xf32> -> vector<16x16xf32>
    %cst_33 = arith.constant 0.176776692 : f32
    %95 = vector.broadcast %cst_33 : f32 to vector<16x16xf32>
    %96 = arith.mulf %94, %95 : vector<16x16xf32>
    %97 = arith.addf %96, %62 : vector<16x16xf32>
    %cst_34 = arith.constant dense<0xFF800000> : vector<16xf32>
    %98 = vector.multi_reduction <maximumf>, %97, %cst_34 [1] : vector<16x16xf32> to vector<16xf32>
    %99 = vector.shape_cast %98 : vector<16xf32> to vector<16x1xf32>
    %100 = vector.broadcast %99 : vector<16x1xf32> to vector<16x16xf32>
    %101 = arith.subf %97, %100 : vector<16x16xf32>
    %102 = math.exp %101 : vector<16x16xf32>
    %cst_35 = arith.constant dense<0.000000e+00> : vector<16xf32>
    %103 = vector.multi_reduction <add>, %102, %cst_35 [1] : vector<16x16xf32> to vector<16xf32>
    %104 = vector.shape_cast %103 : vector<16xf32> to vector<16x1xf32>
    %105 = vector.broadcast %104 : vector<16x1xf32> to vector<16x16xf32>
    %106 = arith.divf %102, %105 : vector<16x16xf32>
    %107 = arith.truncf %106 : vector<16x16xf32> to vector<16x16xbf16>
    %cst_36 = arith.constant dense<0.000000e+00> : vector<16x32xf32>
    %108 = tpu.matmul %107, %93, %cst_36 {dimension_numbers = #tpu.dot_dimension_numbers<[1], [0], [0], [1], [0, 0, 1, 1], [], []>} : vector<16x16xbf16>, vector<16x32xbf16>, vector<16x32xf32> -> vector<16x32xf32>
    %109 = arith.truncf %108 : vector<16x32xf32> to vector<16x32xbf16>
    %c0_37 = arith.constant 0 : index
    %c32 = arith.constant 32 : index
    %110 = vector.load %arg19[%c0_37, %c32] : memref<16x128xbf16, #tpu.memory_space<vmem>>, vector<16x32xbf16>
    tpu.vector_store %arg19[%c0_37, %c32], %109 {strides = array<i32>} : memref<16x128xbf16, #tpu.memory_space<vmem>>, vector<16x32xbf16>,
    %111 = vector.extract_strided_slice %68 {offsets = [0, 64], sizes = [16, 32], strides = [1, 1]} : vector<16x128xbf16> to vector<16x32xbf16>
    %112 = vector.extract_strided_slice %69 {offsets = [0, 64], sizes = [16, 32], strides = [1, 1]} : vector<16x128xbf16> to vector<16x32xbf16>
    %113 = vector.extract_strided_slice %70 {offsets = [0, 64], sizes = [16, 32], strides = [1, 1]} : vector<16x128xbf16> to vector<16x32xbf16>
    %cst_38 = arith.constant dense<0.000000e+00> : vector<16x16xf32>
    %114 = tpu.matmul %111, %112, %cst_38 {dimension_numbers = #tpu.dot_dimension_numbers<[1], [1], [0], [0], [0, 0, 1, 0], [], []>} : vector<16x32xbf16>, vector<16x32xbf16>, vector<16x16xf32> -> vector<16x16xf32>
    %cst_39 = arith.constant 0.176776692 : f32
    %115 = vector.broadcast %cst_39 : f32 to vector<16x16xf32>
    %116 = arith.mulf %114, %115 : vector<16x16xf32>
    %117 = arith.addf %116, %62 : vector<16x16xf32>
    %cst_40 = arith.constant dense<0xFF800000> : vector<16xf32>
    %118 = vector.multi_reduction <maximumf>, %117, %cst_40 [1] : vector<16x16xf32> to vector<16xf32>
    %119 = vector.shape_cast %118 : vector<16xf32> to vector<16x1xf32>
    %120 = vector.broadcast %119 : vector<16x1xf32> to vector<16x16xf32>
    %121 = arith.subf %117, %120 : vector<16x16xf32>
    %122 = math.exp %121 : vector<16x16xf32>
    %cst_41 = arith.constant dense<0.000000e+00> : vector<16xf32>
    %123 = vector.multi_reduction <add>, %122, %cst_41 [1] : vector<16x16xf32> to vector<16xf32>
    %124 = vector.shape_cast %123 : vector<16xf32> to vector<16x1xf32>
    %125 = vector.broadcast %124 : vector<16x1xf32> to vector<16x16xf32>
    %126 = arith.divf %122, %125 : vector<16x16xf32>
    %127 = arith.truncf %126 : vector<16x16xf32> to vector<16x16xbf16>
    %cst_42 = arith.constant dense<0.000000e+00> : vector<16x32xf32>
    %128 = tpu.matmul %127, %113, %cst_42 {dimension_numbers = #tpu.dot_dimension_numbers<[1], [0], [0], [1], [0, 0, 1, 1], [], []>} : vector<16x16xbf16>, vector<16x32xbf16>, vector<16x32xf32> -> vector<16x32xf32>
    %129 = arith.truncf %128 : vector<16x32xf32> to vector<16x32xbf16>
    %c0_43 = arith.constant 0 : index
    %c64 = arith.constant 64 : index
    %130 = vector.load %arg19[%c0_43, %c64] : memref<16x128xbf16, #tpu.memory_space<vmem>>, vector<16x32xbf16>
    tpu.vector_store %arg19[%c0_43, %c64], %129 {strides = array<i32>} : memref<16x128xbf16, #tpu.memory_space<vmem>>, vector<16x32xbf16>,
    %131 = vector.extract_strided_slice %68 {offsets = [0, 96], sizes = [16, 32], strides = [1, 1]} : vector<16x128xbf16> to vector<16x32xbf16>
    %132 = vector.extract_strided_slice %69 {offsets = [0, 96], sizes = [16, 32], strides = [1, 1]} : vector<16x128xbf16> to vector<16x32xbf16>
    %133 = vector.extract_strided_slice %70 {offsets = [0, 96], sizes = [16, 32], strides = [1, 1]} : vector<16x128xbf16> to vector<16x32xbf16>
    %cst_44 = arith.constant dense<0.000000e+00> : vector<16x16xf32>
    %134 = tpu.matmul %131, %132, %cst_44 {dimension_numbers = #tpu.dot_dimension_numbers<[1], [1], [0], [0], [0, 0, 1, 0], [], []>} : vector<16x32xbf16>, vector<16x32xbf16>, vector<16x16xf32> -> vector<16x16xf32>
    %cst_45 = arith.constant 0.176776692 : f32
    %135 = vector.broadcast %cst_45 : f32 to vector<16x16xf32>
    %136 = arith.mulf %134, %135 : vector<16x16xf32>
    %137 = arith.addf %136, %62 : vector<16x16xf32>
    %cst_46 = arith.constant dense<0xFF800000> : vector<16xf32>
    %138 = vector.multi_reduction <maximumf>, %137, %cst_46 [1] : vector<16x16xf32> to vector<16xf32>
    %139 = vector.shape_cast %138 : vector<16xf32> to vector<16x1xf32>
    %140 = vector.broadcast %139 : vector<16x1xf32> to vector<16x16xf32>
    %141 = arith.subf %137, %140 : vector<16x16xf32>
    %142 = math.exp %141 : vector<16x16xf32>
    %cst_47 = arith.constant dense<0.000000e+00> : vector<16xf32>
    %143 = vector.multi_reduction <add>, %142, %cst_47 [1] : vector<16x16xf32> to vector<16xf32>
    %144 = vector.shape_cast %143 : vector<16xf32> to vector<16x1xf32>
    %145 = vector.broadcast %144 : vector<16x1xf32> to vector<16x16xf32>
    %146 = arith.divf %142, %145 : vector<16x16xf32>
    %147 = arith.truncf %146 : vector<16x16xf32> to vector<16x16xbf16>
    %cst_48 = arith.constant dense<0.000000e+00> : vector<16x32xf32>
    %148 = tpu.matmul %147, %133, %cst_48 {dimension_numbers = #tpu.dot_dimension_numbers<[1], [0], [0], [1], [0, 0, 1, 1], [], []>} : vector<16x16xbf16>, vector<16x32xbf16>, vector<16x32xf32> -> vector<16x32xf32>
    %149 = arith.truncf %148 : vector<16x32xf32> to vector<16x32xbf16>
    %c0_49 = arith.constant 0 : index
    %c96 = arith.constant 96 : index
    %150 = vector.load %arg19[%c0_49, %c96] : memref<16x128xbf16, #tpu.memory_space<vmem>>, vector<16x32xbf16>
    tpu.vector_store %arg19[%c0_49, %c96], %149 {strides = array<i32>} : memref<16x128xbf16, #tpu.memory_space<vmem>>, vector<16x32xbf16>,
    %c0_50 = arith.constant 0 : index
    %c0_51 = arith.constant 0 : index
    %151 = vector.load %arg19[%c0_50, %c0_51] : memref<16x128xbf16, #tpu.memory_space<vmem>>, vector<16x128xbf16>
    %c0_52 = arith.constant 0 : index
    %c0_53 = arith.constant 0 : index
    %c0_54 = arith.constant 0 : index
    %152 = vector.load %arg9[%c0_52, %c0_53, %c0_54] : memref<2x128x128xbf16, #tpu.memory_space<vmem>>, vector<1x128x128xbf16>
    %153 = vector.shape_cast %152 : vector<1x128x128xbf16> to vector<128x128xbf16>
    %cst_55 = arith.constant dense<0.000000e+00> : vector<16x128xf32>
    %154 = tpu.matmul %151, %153, %cst_55 {dimension_numbers = #tpu.dot_dimension_numbers<[1], [0], [0], [1], [0, 0, 1, 1], [], []>} : vector<16x128xbf16>, vector<128x128xbf16>, vector<16x128xf32> -> vector<16x128xf32>
    %155 = arith.addf %61, %154 : vector<16x128xf32>
    %c0_56 = arith.constant 0 : index
    %c0_57 = arith.constant 0 : index
    %c0_58 = arith.constant 0 : index
    %156 = vector.load %arg10[%c0_56, %c0_57, %c0_58] : memref<2x1x128xf32, #tpu.memory_space<vmem>>, vector<1x1x128xf32>
    %157 = vector.shape_cast %156 : vector<1x1x128xf32> to vector<1x128xf32>
    %c0_59 = arith.constant 0 : index
    %c0_60 = arith.constant 0 : index
    %c0_61 = arith.constant 0 : index
    %158 = vector.load %arg11[%c0_59, %c0_60, %c0_61] : memref<2x1x128xf32, #tpu.memory_space<vmem>>, vector<1x1x128xf32>
    %159 = vector.shape_cast %158 : vector<1x1x128xf32> to vector<1x128xf32>
    %cst_62 = arith.constant dense<0.000000e+00> : vector<16xf32>
    %160 = vector.multi_reduction <add>, %155, %cst_62 [1] : vector<16x128xf32> to vector<16xf32>
    %161 = vector.shape_cast %160 : vector<16xf32> to vector<16x1xf32>
    %cst_63 = arith.constant 1.280000e+02 : f32
    %162 = vector.broadcast %cst_63 : f32 to vector<16x1xf32>
    %163 = arith.divf %161, %162 : vector<16x1xf32>
    %164 = vector.broadcast %163 : vector<16x1xf32> to vector<16x128xf32>
    %165 = arith.subf %155, %164 : vector<16x128xf32>
    %166 = arith.mulf %165, %165 : vector<16x128xf32>
    %cst_64 = arith.constant dense<0.000000e+00> : vector<16xf32>
    %167 = vector.multi_reduction <add>, %166, %cst_64 [1] : vector<16x128xf32> to vector<16xf32>
    %168 = vector.shape_cast %167 : vector<16xf32> to vector<16x1xf32>
    %cst_65 = arith.constant 1.280000e+02 : f32
    %169 = vector.broadcast %cst_65 : f32 to vector<16x1xf32>
    %170 = arith.divf %168, %169 : vector<16x1xf32>
    %171 = vector.broadcast %163 : vector<16x1xf32> to vector<16x128xf32>
    %172 = arith.subf %155, %171 : vector<16x128xf32>
    %cst_66 = arith.constant 9.99999997E-7 : f32
    %173 = vector.broadcast %cst_66 : f32 to vector<16x1xf32>
    %174 = arith.addf %170, %173 : vector<16x1xf32>
    %175 = math.rsqrt %174 : vector<16x1xf32>
    %176 = vector.broadcast %175 : vector<16x1xf32> to vector<16x128xf32>
    %177 = arith.mulf %172, %176 : vector<16x128xf32>
    %178 = vector.broadcast %157 : vector<1x128xf32> to vector<16x128xf32>
    %179 = arith.mulf %177, %178 : vector<16x128xf32>
    %180 = vector.broadcast %159 : vector<1x128xf32> to vector<16x128xf32>
    %181 = arith.addf %179, %180 : vector<16x128xf32>
    %182 = arith.truncf %181 : vector<16x128xf32> to vector<16x128xbf16>
    %c0_67 = arith.constant 0 : index
    %c0_68 = arith.constant 0 : index
    %c0_69 = arith.constant 0 : index
    %183 = vector.load %arg12[%c0_67, %c0_68, %c0_69] : memref<2x128x256xbf16, #tpu.memory_space<vmem>>, vector<1x128x256xbf16>
    %184 = vector.shape_cast %183 : vector<1x128x256xbf16> to vector<128x256xbf16>
    %cst_70 = arith.constant dense<0.000000e+00> : vector<16x256xf32>
    %185 = tpu.matmul %182, %184, %cst_70 {dimension_numbers = #tpu.dot_dimension_numbers<[1], [0], [0], [1], [0, 0, 1, 1], [], []>} : vector<16x128xbf16>, vector<128x256xbf16>, vector<16x256xf32> -> vector<16x256xf32>
    %c0_71 = arith.constant 0 : index
    %c0_72 = arith.constant 0 : index
    %c0_73 = arith.constant 0 : index
    %186 = vector.load %arg13[%c0_71, %c0_72, %c0_73] : memref<2x1x256xf32, #tpu.memory_space<vmem>>, vector<1x1x256xf32>
    %187 = vector.shape_cast %186 : vector<1x1x256xf32> to vector<1x256xf32>
    %188 = vector.broadcast %187 : vector<1x256xf32> to vector<16x256xf32>
    %189 = arith.addf %185, %188 : vector<16x256xf32>
    %cst_74 = arith.constant 0.000000e+00 : f32
    %190 = vector.broadcast %cst_74 : f32 to vector<16x256xf32>
    %191 = arith.maximumf %189, %190 : vector<16x256xf32>
    %192 = arith.truncf %191 : vector<16x256xf32> to vector<16x256xbf16>
    %c0_75 = arith.constant 0 : index
    %c0_76 = arith.constant 0 : index
    %c0_77 = arith.constant 0 : index
    %193 = vector.load %arg14[%c0_75, %c0_76, %c0_77] : memref<2x256x128xbf16, #tpu.memory_space<vmem>>, vector<1x256x128xbf16>
    %194 = vector.shape_cast %193 : vector<1x256x128xbf16> to vector<256x128xbf16>
    %cst_78 = arith.constant dense<0.000000e+00> : vector<16x128xf32>
    %195 = tpu.matmul %192, %194, %cst_78 {dimension_numbers = #tpu.dot_dimension_numbers<[1], [0], [0], [1], [0, 0, 1, 1], [], []>} : vector<16x256xbf16>, vector<256x128xbf16>, vector<16x128xf32> -> vector<16x128xf32>
    %c0_79 = arith.constant 0 : index
    %c0_80 = arith.constant 0 : index
    %c0_81 = arith.constant 0 : index
    %196 = vector.load %arg15[%c0_79, %c0_80, %c0_81] : memref<2x1x128xf32, #tpu.memory_space<vmem>>, vector<1x1x128xf32>
    %197 = vector.shape_cast %196 : vector<1x1x128xf32> to vector<1x128xf32>
    %198 = vector.broadcast %197 : vector<1x128xf32> to vector<16x128xf32>
    %199 = arith.addf %195, %198 : vector<16x128xf32>
    %200 = arith.addf %181, %199 : vector<16x128xf32>
    %c0_82 = arith.constant 0 : index
    %c0_83 = arith.constant 0 : index
    %c0_84 = arith.constant 0 : index
    %201 = vector.load %arg16[%c0_82, %c0_83, %c0_84] : memref<2x1x128xf32, #tpu.memory_space<vmem>>, vector<1x1x128xf32>
    %202 = vector.shape_cast %201 : vector<1x1x128xf32> to vector<1x128xf32>
    %c0_85 = arith.constant 0 : index
    %c0_86 = arith.constant 0 : index
    %c0_87 = arith.constant 0 : index
    %203 = vector.load %arg17[%c0_85, %c0_86, %c0_87] : memref<2x1x128xf32, #tpu.memory_space<vmem>>, vector<1x1x128xf32>
    %204 = vector.shape_cast %203 : vector<1x1x128xf32> to vector<1x128xf32>
    %cst_88 = arith.constant dense<0.000000e+00> : vector<16xf32>
    %205 = vector.multi_reduction <add>, %200, %cst_88 [1] : vector<16x128xf32> to vector<16xf32>
    %206 = vector.shape_cast %205 : vector<16xf32> to vector<16x1xf32>
    %cst_89 = arith.constant 1.280000e+02 : f32
    %207 = vector.broadcast %cst_89 : f32 to vector<16x1xf32>
    %208 = arith.divf %206, %207 : vector<16x1xf32>
    %209 = vector.broadcast %208 : vector<16x1xf32> to vector<16x128xf32>
    %210 = arith.subf %200, %209 : vector<16x128xf32>
    %211 = arith.mulf %210, %210 : vector<16x128xf32>
    %cst_90 = arith.constant dense<0.000000e+00> : vector<16xf32>
    %212 = vector.multi_reduction <add>, %211, %cst_90 [1] : vector<16x128xf32> to vector<16xf32>
    %213 = vector.shape_cast %212 : vector<16xf32> to vector<16x1xf32>
    %cst_91 = arith.constant 1.280000e+02 : f32
    %214 = vector.broadcast %cst_91 : f32 to vector<16x1xf32>
    %215 = arith.divf %213, %214 : vector<16x1xf32>
    %216 = vector.broadcast %208 : vector<16x1xf32> to vector<16x128xf32>
    %217 = arith.subf %200, %216 : vector<16x128xf32>
    %cst_92 = arith.constant 9.99999997E-7 : f32
    %218 = vector.broadcast %cst_92 : f32 to vector<16x1xf32>
    %219 = arith.addf %215, %218 : vector<16x1xf32>
    %220 = math.rsqrt %219 : vector<16x1xf32>
    %221 = vector.broadcast %220 : vector<16x1xf32> to vector<16x128xf32>
    %222 = arith.mulf %217, %221 : vector<16x128xf32>
    %223 = vector.broadcast %202 : vector<1x128xf32> to vector<16x128xf32>
    %224 = arith.mulf %222, %223 : vector<16x128xf32>
    %225 = vector.broadcast %204 : vector<1x128xf32> to vector<16x128xf32>
    %226 = arith.addf %224, %225 : vector<16x128xf32>
    %227 = arith.truncf %226 : vector<16x128xf32> to vector<16x128xbf16>
    %c1_93 = arith.constant 1 : index
    %c0_94 = arith.constant 0 : index
    %c0_95 = arith.constant 0 : index
    %228 = vector.load %arg8[%c1_93, %c0_94, %c0_95] : memref<2x128x384xbf16, #tpu.memory_space<vmem>>, vector<1x128x384xbf16>
    %229 = vector.shape_cast %228 : vector<1x128x384xbf16> to vector<128x384xbf16>
    %cst_96 = arith.constant dense<0.000000e+00> : vector<16x384xf32>
    %230 = tpu.matmul %227, %229, %cst_96 {dimension_numbers = #tpu.dot_dimension_numbers<[1], [0], [0], [1], [0, 0, 1, 1], [], []>} : vector<16x128xbf16>, vector<128x384xbf16>, vector<16x384xf32> -> vector<16x384xf32>
    %231 = arith.truncf %230 : vector<16x384xf32> to vector<16x384xbf16>
    %232 = vector.extract_strided_slice %231 {offsets = [0, 0], sizes = [16, 128], strides = [1, 1]} : vector<16x384xbf16> to vector<16x128xbf16>
    %233 = vector.extract_strided_slice %231 {offsets = [0, 128], sizes = [16, 128], strides = [1, 1]} : vector<16x384xbf16> to vector<16x128xbf16>
    %234 = vector.extract_strided_slice %231 {offsets = [0, 256], sizes = [16, 128], strides = [1, 1]} : vector<16x384xbf16> to vector<16x128xbf16>
    %235 = vector.extract_strided_slice %232 {offsets = [0, 0], sizes = [16, 32], strides = [1, 1]} : vector<16x128xbf16> to vector<16x32xbf16>
    %236 = vector.extract_strided_slice %233 {offsets = [0, 0], sizes = [16, 32], strides = [1, 1]} : vector<16x128xbf16> to vector<16x32xbf16>
    %237 = vector.extract_strided_slice %234 {offsets = [0, 0], sizes = [16, 32], strides = [1, 1]} : vector<16x128xbf16> to vector<16x32xbf16>
    %cst_97 = arith.constant dense<0.000000e+00> : vector<16x16xf32>
    %238 = tpu.matmul %235, %236, %cst_97 {dimension_numbers = #tpu.dot_dimension_numbers<[1], [1], [0], [0], [0, 0, 1, 0], [], []>} : vector<16x32xbf16>, vector<16x32xbf16>, vector<16x16xf32> -> vector<16x16xf32>
    %cst_98 = arith.constant 0.176776692 : f32
    %239 = vector.broadcast %cst_98 : f32 to vector<16x16xf32>
    %240 = arith.mulf %238, %239 : vector<16x16xf32>
    %241 = arith.addf %240, %62 : vector<16x16xf32>
    %cst_99 = arith.constant dense<0xFF800000> : vector<16xf32>
    %242 = vector.multi_reduction <maximumf>, %241, %cst_99 [1] : vector<16x16xf32> to vector<16xf32>
    %243 = vector.shape_cast %242 : vector<16xf32> to vector<16x1xf32>
    %244 = vector.broadcast %243 : vector<16x1xf32> to vector<16x16xf32>
    %245 = arith.subf %241, %244 : vector<16x16xf32>
    %246 = math.exp %245 : vector<16x16xf32>
    %cst_100 = arith.constant dense<0.000000e+00> : vector<16xf32>
    %247 = vector.multi_reduction <add>, %246, %cst_100 [1] : vector<16x16xf32> to vector<16xf32>
    %248 = vector.shape_cast %247 : vector<16xf32> to vector<16x1xf32>
    %249 = vector.broadcast %248 : vector<16x1xf32> to vector<16x16xf32>
    %250 = arith.divf %246, %249 : vector<16x16xf32>
    %251 = arith.truncf %250 : vector<16x16xf32> to vector<16x16xbf16>
    %cst_101 = arith.constant dense<0.000000e+00> : vector<16x32xf32>
    %252 = tpu.matmul %251, %237, %cst_101 {dimension_numbers = #tpu.dot_dimension_numbers<[1], [0], [0], [1], [0, 0, 1, 1], [], []>} : vector<16x16xbf16>, vector<16x32xbf16>, vector<16x32xf32> -> vector<16x32xf32>
    %253 = arith.truncf %252 : vector<16x32xf32> to vector<16x32xbf16>
    %c0_102 = arith.constant 0 : index
    %c0_103 = arith.constant 0 : index
    %254 = vector.load %arg19[%c0_102, %c0_103] : memref<16x128xbf16, #tpu.memory_space<vmem>>, vector<16x32xbf16>
    tpu.vector_store %arg19[%c0_102, %c0_103], %253 {strides = array<i32>} : memref<16x128xbf16, #tpu.memory_space<vmem>>, vector<16x32xbf16>,
    %255 = vector.extract_strided_slice %232 {offsets = [0, 32], sizes = [16, 32], strides = [1, 1]} : vector<16x128xbf16> to vector<16x32xbf16>
    %256 = vector.extract_strided_slice %233 {offsets = [0, 32], sizes = [16, 32], strides = [1, 1]} : vector<16x128xbf16> to vector<16x32xbf16>
    %257 = vector.extract_strided_slice %234 {offsets = [0, 32], sizes = [16, 32], strides = [1, 1]} : vector<16x128xbf16> to vector<16x32xbf16>
    %cst_104 = arith.constant dense<0.000000e+00> : vector<16x16xf32>
    %258 = tpu.matmul %255, %256, %cst_104 {dimension_numbers = #tpu.dot_dimension_numbers<[1], [1], [0], [0], [0, 0, 1, 0], [], []>} : vector<16x32xbf16>, vector<16x32xbf16>, vector<16x16xf32> -> vector<16x16xf32>
    %cst_105 = arith.constant 0.176776692 : f32
    %259 = vector.broadcast %cst_105 : f32 to vector<16x16xf32>
    %260 = arith.mulf %258, %259 : vector<16x16xf32>
    %261 = arith.addf %260, %62 : vector<16x16xf32>
    %cst_106 = arith.constant dense<0xFF800000> : vector<16xf32>
    %262 = vector.multi_reduction <maximumf>, %261, %cst_106 [1] : vector<16x16xf32> to vector<16xf32>
    %263 = vector.shape_cast %262 : vector<16xf32> to vector<16x1xf32>
    %264 = vector.broadcast %263 : vector<16x1xf32> to vector<16x16xf32>
    %265 = arith.subf %261, %264 : vector<16x16xf32>
    %266 = math.exp %265 : vector<16x16xf32>
    %cst_107 = arith.constant dense<0.000000e+00> : vector<16xf32>
    %267 = vector.multi_reduction <add>, %266, %cst_107 [1] : vector<16x16xf32> to vector<16xf32>
    %268 = vector.shape_cast %267 : vector<16xf32> to vector<16x1xf32>
    %269 = vector.broadcast %268 : vector<16x1xf32> to vector<16x16xf32>
    %270 = arith.divf %266, %269 : vector<16x16xf32>
    %271 = arith.truncf %270 : vector<16x16xf32> to vector<16x16xbf16>
    %cst_108 = arith.constant dense<0.000000e+00> : vector<16x32xf32>
    %272 = tpu.matmul %271, %257, %cst_108 {dimension_numbers = #tpu.dot_dimension_numbers<[1], [0], [0], [1], [0, 0, 1, 1], [], []>} : vector<16x16xbf16>, vector<16x32xbf16>, vector<16x32xf32> -> vector<16x32xf32>
    %273 = arith.truncf %272 : vector<16x32xf32> to vector<16x32xbf16>
    %c0_109 = arith.constant 0 : index
    %c32_110 = arith.constant 32 : index
    %274 = vector.load %arg19[%c0_109, %c32_110] : memref<16x128xbf16, #tpu.memory_space<vmem>>, vector<16x32xbf16>
    tpu.vector_store %arg19[%c0_109, %c32_110], %273 {strides = array<i32>} : memref<16x128xbf16, #tpu.memory_space<vmem>>, vector<16x32xbf16>,
    %275 = vector.extract_strided_slice %232 {offsets = [0, 64], sizes = [16, 32], strides = [1, 1]} : vector<16x128xbf16> to vector<16x32xbf16>
    %276 = vector.extract_strided_slice %233 {offsets = [0, 64], sizes = [16, 32], strides = [1, 1]} : vector<16x128xbf16> to vector<16x32xbf16>
    %277 = vector.extract_strided_slice %234 {offsets = [0, 64], sizes = [16, 32], strides = [1, 1]} : vector<16x128xbf16> to vector<16x32xbf16>
    %cst_111 = arith.constant dense<0.000000e+00> : vector<16x16xf32>
    %278 = tpu.matmul %275, %276, %cst_111 {dimension_numbers = #tpu.dot_dimension_numbers<[1], [1], [0], [0], [0, 0, 1, 0], [], []>} : vector<16x32xbf16>, vector<16x32xbf16>, vector<16x16xf32> -> vector<16x16xf32>
    %cst_112 = arith.constant 0.176776692 : f32
    %279 = vector.broadcast %cst_112 : f32 to vector<16x16xf32>
    %280 = arith.mulf %278, %279 : vector<16x16xf32>
    %281 = arith.addf %280, %62 : vector<16x16xf32>
    %cst_113 = arith.constant dense<0xFF800000> : vector<16xf32>
    %282 = vector.multi_reduction <maximumf>, %281, %cst_113 [1] : vector<16x16xf32> to vector<16xf32>
    %283 = vector.shape_cast %282 : vector<16xf32> to vector<16x1xf32>
    %284 = vector.broadcast %283 : vector<16x1xf32> to vector<16x16xf32>
    %285 = arith.subf %281, %284 : vector<16x16xf32>
    %286 = math.exp %285 : vector<16x16xf32>
    %cst_114 = arith.constant dense<0.000000e+00> : vector<16xf32>
    %287 = vector.multi_reduction <add>, %286, %cst_114 [1] : vector<16x16xf32> to vector<16xf32>
    %288 = vector.shape_cast %287 : vector<16xf32> to vector<16x1xf32>
    %289 = vector.broadcast %288 : vector<16x1xf32> to vector<16x16xf32>
    %290 = arith.divf %286, %289 : vector<16x16xf32>
    %291 = arith.truncf %290 : vector<16x16xf32> to vector<16x16xbf16>
    %cst_115 = arith.constant dense<0.000000e+00> : vector<16x32xf32>
    %292 = tpu.matmul %291, %277, %cst_115 {dimension_numbers = #tpu.dot_dimension_numbers<[1], [0], [0], [1], [0, 0, 1, 1], [], []>} : vector<16x16xbf16>, vector<16x32xbf16>, vector<16x32xf32> -> vector<16x32xf32>
    %293 = arith.truncf %292 : vector<16x32xf32> to vector<16x32xbf16>
    %c0_116 = arith.constant 0 : index
    %c64_117 = arith.constant 64 : index
    %294 = vector.load %arg19[%c0_116, %c64_117] : memref<16x128xbf16, #tpu.memory_space<vmem>>, vector<16x32xbf16>
    tpu.vector_store %arg19[%c0_116, %c64_117], %293 {strides = array<i32>} : memref<16x128xbf16, #tpu.memory_space<vmem>>, vector<16x32xbf16>,
    %295 = vector.extract_strided_slice %232 {offsets = [0, 96], sizes = [16, 32], strides = [1, 1]} : vector<16x128xbf16> to vector<16x32xbf16>
    %296 = vector.extract_strided_slice %233 {offsets = [0, 96], sizes = [16, 32], strides = [1, 1]} : vector<16x128xbf16> to vector<16x32xbf16>
    %297 = vector.extract_strided_slice %234 {offsets = [0, 96], sizes = [16, 32], strides = [1, 1]} : vector<16x128xbf16> to vector<16x32xbf16>
    %cst_118 = arith.constant dense<0.000000e+00> : vector<16x16xf32>
    %298 = tpu.matmul %295, %296, %cst_118 {dimension_numbers = #tpu.dot_dimension_numbers<[1], [1], [0], [0], [0, 0, 1, 0], [], []>} : vector<16x32xbf16>, vector<16x32xbf16>, vector<16x16xf32> -> vector<16x16xf32>
    %cst_119 = arith.constant 0.176776692 : f32
    %299 = vector.broadcast %cst_119 : f32 to vector<16x16xf32>
    %300 = arith.mulf %298, %299 : vector<16x16xf32>
    %301 = arith.addf %300, %62 : vector<16x16xf32>
    %cst_120 = arith.constant dense<0xFF800000> : vector<16xf32>
    %302 = vector.multi_reduction <maximumf>, %301, %cst_120 [1] : vector<16x16xf32> to vector<16xf32>
    %303 = vector.shape_cast %302 : vector<16xf32> to vector<16x1xf32>
    %304 = vector.broadcast %303 : vector<16x1xf32> to vector<16x16xf32>
    %305 = arith.subf %301, %304 : vector<16x16xf32>
    %306 = math.exp %305 : vector<16x16xf32>
    %cst_121 = arith.constant dense<0.000000e+00> : vector<16xf32>
    %307 = vector.multi_reduction <add>, %306, %cst_121 [1] : vector<16x16xf32> to vector<16xf32>
    %308 = vector.shape_cast %307 : vector<16xf32> to vector<16x1xf32>
    %309 = vector.broadcast %308 : vector<16x1xf32> to vector<16x16xf32>
    %310 = arith.divf %306, %309 : vector<16x16xf32>
    %311 = arith.truncf %310 : vector<16x16xf32> to vector<16x16xbf16>
    %cst_122 = arith.constant dense<0.000000e+00> : vector<16x32xf32>
    %312 = tpu.matmul %311, %297, %cst_122 {dimension_numbers = #tpu.dot_dimension_numbers<[1], [0], [0], [1], [0, 0, 1, 1], [], []>} : vector<16x16xbf16>, vector<16x32xbf16>, vector<16x32xf32> -> vector<16x32xf32>
    %313 = arith.truncf %312 : vector<16x32xf32> to vector<16x32xbf16>
    %c0_123 = arith.constant 0 : index
    %c96_124 = arith.constant 96 : index
    %314 = vector.load %arg19[%c0_123, %c96_124] : memref<16x128xbf16, #tpu.memory_space<vmem>>, vector<16x32xbf16>
    tpu.vector_store %arg19[%c0_123, %c96_124], %313 {strides = array<i32>} : memref<16x128xbf16, #tpu.memory_space<vmem>>, vector<16x32xbf16>,
    %c0_125 = arith.constant 0 : index
    %c0_126 = arith.constant 0 : index
    %315 = vector.load %arg19[%c0_125, %c0_126] : memref<16x128xbf16, #tpu.memory_space<vmem>>, vector<16x128xbf16>
    %c1_127 = arith.constant 1 : index
    %c0_128 = arith.constant 0 : index
    %c0_129 = arith.constant 0 : index
    %316 = vector.load %arg9[%c1_127, %c0_128, %c0_129] : memref<2x128x128xbf16, #tpu.memory_space<vmem>>, vector<1x128x128xbf16>
    %317 = vector.shape_cast %316 : vector<1x128x128xbf16> to vector<128x128xbf16>
    %cst_130 = arith.constant dense<0.000000e+00> : vector<16x128xf32>
    %318 = tpu.matmul %315, %317, %cst_130 {dimension_numbers = #tpu.dot_dimension_numbers<[1], [0], [0], [1], [0, 0, 1, 1], [], []>} : vector<16x128xbf16>, vector<128x128xbf16>, vector<16x128xf32> -> vector<16x128xf32>
    %319 = arith.addf %226, %318 : vector<16x128xf32>
    %c1_131 = arith.constant 1 : index
    %c0_132 = arith.constant 0 : index
    %c0_133 = arith.constant 0 : index
    %320 = vector.load %arg10[%c1_131, %c0_132, %c0_133] : memref<2x1x128xf32, #tpu.memory_space<vmem>>, vector<1x1x128xf32>
    %321 = vector.shape_cast %320 : vector<1x1x128xf32> to vector<1x128xf32>
    %c1_134 = arith.constant 1 : index
    %c0_135 = arith.constant 0 : index
    %c0_136 = arith.constant 0 : index
    %322 = vector.load %arg11[%c1_134, %c0_135, %c0_136] : memref<2x1x128xf32, #tpu.memory_space<vmem>>, vector<1x1x128xf32>
    %323 = vector.shape_cast %322 : vector<1x1x128xf32> to vector<1x128xf32>
    %cst_137 = arith.constant dense<0.000000e+00> : vector<16xf32>
    %324 = vector.multi_reduction <add>, %319, %cst_137 [1] : vector<16x128xf32> to vector<16xf32>
    %325 = vector.shape_cast %324 : vector<16xf32> to vector<16x1xf32>
    %cst_138 = arith.constant 1.280000e+02 : f32
    %326 = vector.broadcast %cst_138 : f32 to vector<16x1xf32>
    %327 = arith.divf %325, %326 : vector<16x1xf32>
    %328 = vector.broadcast %327 : vector<16x1xf32> to vector<16x128xf32>
    %329 = arith.subf %319, %328 : vector<16x128xf32>
    %330 = arith.mulf %329, %329 : vector<16x128xf32>
    %cst_139 = arith.constant dense<0.000000e+00> : vector<16xf32>
    %331 = vector.multi_reduction <add>, %330, %cst_139 [1] : vector<16x128xf32> to vector<16xf32>
    %332 = vector.shape_cast %331 : vector<16xf32> to vector<16x1xf32>
    %cst_140 = arith.constant 1.280000e+02 : f32
    %333 = vector.broadcast %cst_140 : f32 to vector<16x1xf32>
    %334 = arith.divf %332, %333 : vector<16x1xf32>
    %335 = vector.broadcast %327 : vector<16x1xf32> to vector<16x128xf32>
    %336 = arith.subf %319, %335 : vector<16x128xf32>
    %cst_141 = arith.constant 9.99999997E-7 : f32
    %337 = vector.broadcast %cst_141 : f32 to vector<16x1xf32>
    %338 = arith.addf %334, %337 : vector<16x1xf32>
    %339 = math.rsqrt %338 : vector<16x1xf32>
    %340 = vector.broadcast %339 : vector<16x1xf32> to vector<16x128xf32>
    %341 = arith.mulf %336, %340 : vector<16x128xf32>
    %342 = vector.broadcast %321 : vector<1x128xf32> to vector<16x128xf32>
    %343 = arith.mulf %341, %342 : vector<16x128xf32>
    %344 = vector.broadcast %323 : vector<1x128xf32> to vector<16x128xf32>
    %345 = arith.addf %343, %344 : vector<16x128xf32>
    %346 = arith.truncf %345 : vector<16x128xf32> to vector<16x128xbf16>
    %c1_142 = arith.constant 1 : index
    %c0_143 = arith.constant 0 : index
    %c0_144 = arith.constant 0 : index
    %347 = vector.load %arg12[%c1_142, %c0_143, %c0_144] : memref<2x128x256xbf16, #tpu.memory_space<vmem>>, vector<1x128x256xbf16>
    %348 = vector.shape_cast %347 : vector<1x128x256xbf16> to vector<128x256xbf16>
    %cst_145 = arith.constant dense<0.000000e+00> : vector<16x256xf32>
    %349 = tpu.matmul %346, %348, %cst_145 {dimension_numbers = #tpu.dot_dimension_numbers<[1], [0], [0], [1], [0, 0, 1, 1], [], []>} : vector<16x128xbf16>, vector<128x256xbf16>, vector<16x256xf32> -> vector<16x256xf32>
    %c1_146 = arith.constant 1 : index
    %c0_147 = arith.constant 0 : index
    %c0_148 = arith.constant 0 : index
    %350 = vector.load %arg13[%c1_146, %c0_147, %c0_148] : memref<2x1x256xf32, #tpu.memory_space<vmem>>, vector<1x1x256xf32>
    %351 = vector.shape_cast %350 : vector<1x1x256xf32> to vector<1x256xf32>
    %352 = vector.broadcast %351 : vector<1x256xf32> to vector<16x256xf32>
    %353 = arith.addf %349, %352 : vector<16x256xf32>
    %cst_149 = arith.constant 0.000000e+00 : f32
    %354 = vector.broadcast %cst_149 : f32 to vector<16x256xf32>
    %355 = arith.maximumf %353, %354 : vector<16x256xf32>
    %356 = arith.truncf %355 : vector<16x256xf32> to vector<16x256xbf16>
    %c1_150 = arith.constant 1 : index
    %c0_151 = arith.constant 0 : index
    %c0_152 = arith.constant 0 : index
    %357 = vector.load %arg14[%c1_150, %c0_151, %c0_152] : memref<2x256x128xbf16, #tpu.memory_space<vmem>>, vector<1x256x128xbf16>
    %358 = vector.shape_cast %357 : vector<1x256x128xbf16> to vector<256x128xbf16>
    %cst_153 = arith.constant dense<0.000000e+00> : vector<16x128xf32>
    %359 = tpu.matmul %356, %358, %cst_153 {dimension_numbers = #tpu.dot_dimension_numbers<[1], [0], [0], [1], [0, 0, 1, 1], [], []>} : vector<16x256xbf16>, vector<256x128xbf16>, vector<16x128xf32> -> vector<16x128xf32>
    %c1_154 = arith.constant 1 : index
    %c0_155 = arith.constant 0 : index
    %c0_156 = arith.constant 0 : index
    %360 = vector.load %arg15[%c1_154, %c0_155, %c0_156] : memref<2x1x128xf32, #tpu.memory_space<vmem>>, vector<1x1x128xf32>
    %361 = vector.shape_cast %360 : vector<1x1x128xf32> to vector<1x128xf32>
    %362 = vector.broadcast %361 : vector<1x128xf32> to vector<16x128xf32>
    %363 = arith.addf %359, %362 : vector<16x128xf32>
    %364 = arith.addf %345, %363 : vector<16x128xf32>
    %c1_157 = arith.constant 1 : index
    %c0_158 = arith.constant 0 : index
    %c0_159 = arith.constant 0 : index
    %365 = vector.load %arg16[%c1_157, %c0_158, %c0_159] : memref<2x1x128xf32, #tpu.memory_space<vmem>>, vector<1x1x128xf32>
    %366 = vector.shape_cast %365 : vector<1x1x128xf32> to vector<1x128xf32>
    %c1_160 = arith.constant 1 : index
    %c0_161 = arith.constant 0 : index
    %c0_162 = arith.constant 0 : index
    %367 = vector.load %arg17[%c1_160, %c0_161, %c0_162] : memref<2x1x128xf32, #tpu.memory_space<vmem>>, vector<1x1x128xf32>
    %368 = vector.shape_cast %367 : vector<1x1x128xf32> to vector<1x128xf32>
    %cst_163 = arith.constant dense<0.000000e+00> : vector<16xf32>
    %369 = vector.multi_reduction <add>, %364, %cst_163 [1] : vector<16x128xf32> to vector<16xf32>
    %370 = vector.shape_cast %369 : vector<16xf32> to vector<16x1xf32>
    %cst_164 = arith.constant 1.280000e+02 : f32
    %371 = vector.broadcast %cst_164 : f32 to vector<16x1xf32>
    %372 = arith.divf %370, %371 : vector<16x1xf32>
    %373 = vector.broadcast %372 : vector<16x1xf32> to vector<16x128xf32>
    %374 = arith.subf %364, %373 : vector<16x128xf32>
    %375 = arith.mulf %374, %374 : vector<16x128xf32>
    %cst_165 = arith.constant dense<0.000000e+00> : vector<16xf32>
    %376 = vector.multi_reduction <add>, %375, %cst_165 [1] : vector<16x128xf32> to vector<16xf32>
    %377 = vector.shape_cast %376 : vector<16xf32> to vector<16x1xf32>
    %cst_166 = arith.constant 1.280000e+02 : f32
    %378 = vector.broadcast %cst_166 : f32 to vector<16x1xf32>
    %379 = arith.divf %377, %378 : vector<16x1xf32>
    %380 = vector.broadcast %372 : vector<16x1xf32> to vector<16x128xf32>
    %381 = arith.subf %364, %380 : vector<16x128xf32>
    %cst_167 = arith.constant 9.99999997E-7 : f32
    %382 = vector.broadcast %cst_167 : f32 to vector<16x1xf32>
    %383 = arith.addf %379, %382 : vector<16x1xf32>
    %384 = math.rsqrt %383 : vector<16x1xf32>
    %385 = vector.broadcast %384 : vector<16x1xf32> to vector<16x128xf32>
    %386 = arith.mulf %381, %385 : vector<16x128xf32>
    %387 = vector.broadcast %366 : vector<1x128xf32> to vector<16x128xf32>
    %388 = arith.mulf %386, %387 : vector<16x128xf32>
    %389 = vector.broadcast %368 : vector<1x128xf32> to vector<16x128xf32>
    %390 = arith.addf %388, %389 : vector<16x128xf32>
    %c0_168 = arith.constant 0 : index
    %c0_169 = arith.constant 0 : index
    %391 = vector.load %arg18[%c0_168, %c0_169] : memref<16x128xf32, #tpu.memory_space<vmem>>, vector<16x128xf32>
    tpu.vector_store %arg18[%c0_168, %c0_169], %390 {strides = array<i32>} : memref<16x128xf32, #tpu.memory_space<vmem>>, vector<16x128xf32>,
    return
  }
  func.func @transform_0(%arg0: i32) -> (i32, i32) {
    %c0_i32 = arith.constant 0 : i32
    %c0_i32_0 = arith.constant 0 : i32
    %c0_i32_1 = arith.constant 0 : i32
    return %c0_i32, %c0_i32_0 : i32, i32
  }
  func.func @transform_1(%arg0: i32) -> (i32, i32) {
    %c0_i32 = arith.constant 0 : i32
    %c0_i32_0 = arith.constant 0 : i32
    %c0_i32_1 = arith.constant 0 : i32
    return %c0_i32, %c0_i32_0 : i32, i32
  }
  func.func @transform_2(%arg0: i32) -> (i32, i32) {
    %c0_i32 = arith.constant 0 : i32
    %c0_i32_0 = arith.constant 0 : i32
    %c0_i32_1 = arith.constant 0 : i32
    return %c0_i32, %c0_i32_0 : i32, i32
  }
  func.func @transform_3(%arg0: i32) -> (i32, i32) {
    %c0_i32 = arith.constant 0 : i32
    %c0_i32_0 = arith.constant 0 : i32
    %c0_i32_1 = arith.constant 0 : i32
    return %c0_i32, %c0_i32_0 : i32, i32
  }
  func.func @transform_4(%arg0: i32) -> (i32, i32) {
    %c0_i32 = arith.constant 0 : i32
    %c0_i32_0 = arith.constant 0 : i32
    %c0_i32_1 = arith.constant 0 : i32
    return %c0_i32, %c0_i32_0 : i32, i32
  }
  func.func @transform_5(%arg0: i32) -> (i32, i32) {
    %c0_i32 = arith.constant 0 : i32
    %c0_i32_0 = arith.constant 0 : i32
    %c0_i32_1 = arith.constant 0 : i32
    return %c0_i32, %c0_i32_0 : i32, i32
  }
  func.func @transform_6(%arg0: i32) -> (i32, i32) {
    %c0_i32 = arith.constant 0 : i32
    %c0_i32_0 = arith.constant 0 : i32
    %c0_i32_1 = arith.constant 0 : i32
    return %c0_i32, %c0_i32_0 : i32, i32
  }
  func.func @transform_7(%arg0: i32) -> (i32, i32, i32) {
    %c0_i32 = arith.constant 0 : i32
    %c0_i32_0 = arith.constant 0 : i32
    %c0_i32_1 = arith.constant 0 : i32
    %c0_i32_2 = arith.constant 0 : i32
    return %c0_i32, %c0_i32_0, %c0_i32_1 : i32, i32, i32
  }
  func.func @transform_8(%arg0: i32) -> (i32, i32, i32) {
    %c0_i32 = arith.constant 0 : i32
    %c0_i32_0 = arith.constant 0 : i32
    %c0_i32_1 = arith.constant 0 : i32
    %c0_i32_2 = arith.constant 0 : i32
    return %c0_i32, %c0_i32_0, %c0_i32_1 : i32, i32, i32
  }
  func.func @transform_9(%arg0: i32) -> (i32, i32, i32) {
    %c0_i32 = arith.constant 0 : i32
    %c0_i32_0 = arith.constant 0 : i32
    %c0_i32_1 = arith.constant 0 : i32
    %c0_i32_2 = arith.constant 0 : i32
    return %c0_i32, %c0_i32_0, %c0_i32_1 : i32, i32, i32
  }
  func.func @transform_10(%arg0: i32) -> (i32, i32, i32) {
    %c0_i32 = arith.constant 0 : i32
    %c0_i32_0 = arith.constant 0 : i32
    %c0_i32_1 = arith.constant 0 : i32
    %c0_i32_2 = arith.constant 0 : i32
    return %c0_i32, %c0_i32_0, %c0_i32_1 : i32, i32, i32
  }
  func.func @transform_11(%arg0: i32) -> (i32, i32, i32) {
    %c0_i32 = arith.constant 0 : i32
    %c0_i32_0 = arith.constant 0 : i32
    %c0_i32_1 = arith.constant 0 : i32
    %c0_i32_2 = arith.constant 0 : i32
    return %c0_i32, %c0_i32_0, %c0_i32_1 : i32, i32, i32
  }
  func.func @transform_12(%arg0: i32) -> (i32, i32, i32) {
    %c0_i32 = arith.constant 0 : i32
    %c0_i32_0 = arith.constant 0 : i32
    %c0_i32_1 = arith.constant 0 : i32
    %c0_i32_2 = arith.constant 0 : i32
    return %c0_i32, %c0_i32_0, %c0_i32_1 : i32, i32, i32
  }
  func.func @transform_13(%arg0: i32) -> (i32, i32, i32) {
    %c0_i32 = arith.constant 0 : i32
    %c0_i32_0 = arith.constant 0 : i32
    %c0_i32_1 = arith.constant 0 : i32
    %c0_i32_2 = arith.constant 0 : i32
    return %c0_i32, %c0_i32_0, %c0_i32_1 : i32, i32, i32
  }
  func.func @transform_14(%arg0: i32) -> (i32, i32, i32) {
    %c0_i32 = arith.constant 0 : i32
    %c0_i32_0 = arith.constant 0 : i32
    %c0_i32_1 = arith.constant 0 : i32
    %c0_i32_2 = arith.constant 0 : i32
    return %c0_i32, %c0_i32_0, %c0_i32_1 : i32, i32, i32
  }
  func.func @transform_15(%arg0: i32) -> (i32, i32, i32) {
    %c0_i32 = arith.constant 0 : i32
    %c0_i32_0 = arith.constant 0 : i32
    %c0_i32_1 = arith.constant 0 : i32
    %c0_i32_2 = arith.constant 0 : i32
    return %c0_i32, %c0_i32_0, %c0_i32_1 : i32, i32, i32
  }
  func.func @transform_16(%arg0: i32) -> (i32, i32, i32) {
    %c0_i32 = arith.constant 0 : i32
    %c0_i32_0 = arith.constant 0 : i32
    %c0_i32_1 = arith.constant 0 : i32
    %c0_i32_2 = arith.constant 0 : i32
    return %c0_i32, %c0_i32_0, %c0_i32_1 : i32, i32, i32
  }
  func.func @transform_17(%arg0: i32) -> (i32, i32) {
    %c0_i32 = arith.constant 0 : i32
    %c0_i32_0 = arith.constant 0 : i32
    %c0_i32_1 = arith.constant 0 : i32
    return %c0_i32, %c0_i32_0 : i32, i32
  }
}

</mosaic_0001>

<bundles_post_ra>
// kernel: tpu_custom_call.1
= control target key start
LH: loop header
LB: loop body
LE: loop exit
PB: predicated region body
PF: predicated region fallthrough
CT: control target
= control target key end

     0   :  { %s4364_s0 = inlined_call_operand.vmem [shape: f32[16,16], index: 0, kind: input, shape index: {}]   ;;  %s4365_s1 = inlined_call_operand.vmem [shape: s32[16,1], index: 1, kind: input, shape index: {}]   ;;  %s4366_s2 = inlined_call_operand.hbm [shape: f32[16,128], index: 2, kind: input, shape index: {}]   ;;  %s4367_s3 = inlined_call_operand.hbm [shape: f32[4,128], index: 3, kind: input, shape index: {}]   ;;  %s4368_s4 = inlined_call_operand.vmem [shape: f32[16,128], index: 4, kind: input, shape index: {}]   ;;  %s4369_s5 = inlined_call_operand.vmem [shape: f32[1,128], index: 5, kind: input, shape index: {}]   ;;  %s4370_s6 = inlined_call_operand.hbm [shape: f32[1,128], index: 6, kind: input, shape index: {}]   ;;  %s4371_s7 = inlined_call_operand.hbm [shape: bf16[2,128,384], index: 7, kind: input, shape index: {}]   ;;  %s4372_s8 = inlined_call_operand.hbm [shape: bf16[2,128,128], index: 8, kind: input, shape index: {}]   ;;  %s4373_s9 = inlined_call_operand.vmem [shape: f32[2,1,128], index: 9, kind: input, shape index: {}]   ;;  %s4374_s10 = inlined_call_operand.vmem [shape: f32[2,1,128], index: 10, kind: input, shape index: {}]   ;;  %s4375_s11 = inlined_call_operand.hbm [shape: bf16[2,128,256], index: 11, kind: input, shape index: {}]   ;;  %s4376_s12 = inlined_call_operand.vmem [shape: f32[2,1,256], index: 12, kind: input, shape index: {}]   ;;  %s4377_s13 = inlined_call_operand.hbm [shape: bf16[2,256,128], index: 13, kind: input, shape index: {}]   ;;  %s4378_s14 = inlined_call_operand.vmem [shape: f32[2,1,128], index: 14, kind: input, shape index: {}]   ;;  %s4379_s15 = inlined_call_operand.vmem [shape: f32[2,1,128], index: 15, kind: input, shape index: {}]   ;;  %s4380_s16 = inlined_call_operand.vmem [shape: f32[2,1,128], index: 16, kind: input, shape index: {}]   ;;  %s4381_s17 = inlined_call_operand.hbm [shape: f32[16,128], index: 17, kind: output, shape index: {}]  }
   0x1   :  { %4384 = sst [smem:[#allocation21_spill]] %s4364_s0 }
   0x2   :  { %4385 = sst [smem:[#allocation22_spill]] %s4365_s1 }
   0x3   :  { %22 = vsyncpa [#allocation4], 0 }
   0x4   :  { %23 = vsyncpa [#allocation7], 0 }
   0x5   :  { %24 = vsyncpa [#allocation10], 0 }
   0x6   :  { %25 = vsyncpa [#allocation13], 0 }
   0x7   :  { %26 = vsyncpa [#allocation5], 0  ;;  %s3798_s24 = smov [#allocation6]   ;;  %s3799_s26 = smov [#allocation9]  }
   0x8   :  { %s49_s25 = sshll.u32 %s3798_s24, 4  ;;  %s72_s27 = sshll.u32 %s3799_s26, 4  ;;  %s50_s25 = int_to_ptr.vmem [resolvable:$true] %s49_s25  ;;  %s3907_s27 = int_to_ptr.vmem [resolvable:$true] %s72_s27 }
   0x9   :  { %s3612_s0 = scalar_lea.hbm %s4367_s3, 64 }
   0xa   :  { %p3613_p0 = scmp.ne.s32.totalorder %s4367_s3, %s3612_s0  ;;  %p3616_p1 = scmp.lt.u32.totalorder %s3612_s0, %s4367_s3 }
   0xc   :  { %p3618_p2 = pnand %p3616_p1, %p3613_p0 }
   0xe   :  { %3621 = shalt.err (!%p3618_p2)
}
   0xf   :  { %s3622_s20 = scalar_lea.vmem %s50_s25, 64  ;;  %p3627_p4 = scmp.lt.s32.totalorder %s50_s25, %s50_s25 }
  0x10   :  { %p3623_p3 = scmp.ne.s32.totalorder %s50_s25, %s3622_s20  ;;  %p3628_p5 = scmp.lt.s32.totalorder %s3622_s20, %s3622_s20 }
  0x12   :  { %p3629_p6 = por %p3628_p5, %p3627_p4 }
  0x14   :  { %p3630_p7 = pnand %p3629_p6, %p3623_p3 }
  0x16   :  { %3633 = shalt.err (!%p3630_p7)
}
  0x17   :  { %52 = dma.hbm_to_vmem [thread:$0]  %s4367_s3, 64, %s50_s25, [#allocation7]  }
  0x18   :  { %s3634_s26 = scalar_lea.hbm %s4371_s7, 6144 }
  0x19   :  { %p3635_p8 = scmp.ne.s32.totalorder %s4371_s7, %s3634_s26  ;;  %p3638_p9 = scmp.lt.u32.totalorder %s3634_s26, %s4371_s7 }
  0x1b   :  { %p3640_p10 = pnand %p3638_p9, %p3635_p8 }
  0x1d   :  { %3643 = shalt.err (!%p3640_p10)
}
  0x1e   :  { %s3644_s18 = scalar_lea.vmem %s3907_s27, 6144  ;;  %p3649_p12 = scmp.lt.s32.totalorder %s3907_s27, %s3907_s27 }
  0x1f   :  { %p3645_p11 = scmp.ne.s32.totalorder %s3907_s27, %s3644_s18  ;;  %p3650_p13 = scmp.lt.s32.totalorder %s3644_s18, %s3644_s18 }
  0x21   :  { %p3651_p0 = por %p3650_p13, %p3649_p12 }
  0x23   :  { %p3652_p1 = pnand %p3651_p0, %p3645_p11 }
  0x25   :  { %3655 = shalt.err (!%p3652_p1)
}
  0x26   :  { %s3800_s3 = smov 192   ;;  %s3801_s25 = smov 12  }
  0x27   :  { %78 = dma.hbm_to_vmem [thread:$0]  %s4371_s7, 6144, %s3907_s27, [#allocation10], %s3800_s3, %s3800_s3, %s3801_s25  }
  0x28   :  { %s3802_s20 = smov [#allocation12]   ;;  %s3803_s22 = smov [#allocation3]  }
  0x29   :  { %s100_s21 = sshll.u32 %s3802_s20, 4  ;;  %s36_s23 = sshll.u32 %s3803_s22, 4  ;;  %s101_s21 = int_to_ptr.vmem [resolvable:$true] %s100_s21  ;;  %s3938_s23 = int_to_ptr.vmem [resolvable:$true] %s36_s23 }
  0x2a   :  { %s3656_s28 = scalar_lea.hbm %s4375_s11, 4096 }
  0x2b   :  { %p3657_p2 = scmp.ne.s32.totalorder %s4375_s11, %s3656_s28  ;;  %p3660_p3 = scmp.lt.u32.totalorder %s3656_s28, %s4375_s11 }
  0x2d   :  { %p3662_p4 = pnand %p3660_p3, %p3657_p2 }
  0x2f   :  { %3665 = shalt.err (!%p3662_p4)
}
  0x30   :  { %s3666_s7 = scalar_lea.vmem %s101_s21, 4096  ;;  %p3671_p6 = scmp.lt.s32.totalorder %s101_s21, %s101_s21 }
  0x31   :  { %p3667_p5 = scmp.ne.s32.totalorder %s101_s21, %s3666_s7  ;;  %p3672_p7 = scmp.lt.s32.totalorder %s3666_s7, %s3666_s7 }
  0x33   :  { %p3673_p8 = por %p3672_p7, %p3671_p6 }
  0x35   :  { %p3674_p9 = pnand %p3673_p8, %p3667_p5 }
  0x37   :  { %3677 = shalt.err (!%p3674_p9)
}
  0x38   :  { %s3804_s27 = smov 128   ;;  %s3805_s3 = smov 8  }
  0x39   :  { %106 = dma.hbm_to_vmem [thread:$0]  %s4375_s11, 4096, %s101_s21, [#allocation13], %s3804_s27, %s3804_s27, %s3805_s3  }
  0x3a   :  { %s3678_s22 = scalar_lea.hbm %s4366_s2, 256 }
  0x3b   :  { %p3679_p10 = scmp.ne.s32.totalorder %s4366_s2, %s3678_s22  ;;  %p3682_p11 = scmp.lt.u32.totalorder %s3678_s22, %s4366_s2 }
  0x3d   :  { %p3684_p12 = pnand %p3682_p11, %p3679_p10 }
  0x3f   :  { %3687 = shalt.err (!%p3684_p12)
}
  0x40   :  { %s3688_s0 = scalar_lea.vmem %s3938_s23, 256  ;;  %p3693_p0 = scmp.lt.s32.totalorder %s3938_s23, %s3938_s23 }
  0x41   :  { %p3689_p13 = scmp.ne.s32.totalorder %s3938_s23, %s3688_s0  ;;  %p3694_p1 = scmp.lt.s32.totalorder %s3688_s0, %s3688_s0 }
  0x43   :  { %p3695_p2 = por %p3694_p1, %p3693_p0 }
  0x45   :  { %p3696_p3 = pnand %p3695_p2, %p3689_p13 }
  0x47   :  { %3699 = shalt.err (!%p3696_p3)
}
  0x48   :  { %42 = dma.hbm_to_vmem [thread:$0]  %s4366_s2, 256, %s3938_s23, [#allocation4], %s3804_s27, %s3804_s27, %s3805_s3  }
  0x49   :  { %s3806_s30 = smov [#allocation8]   ;;  %s3807_s7 = smov [#allocation11]  }
  0x4a   :  { %s63_s18 = sshll.u32 %s3806_s30, 4  ;;  %s84_s25 = sshll.u32 %s3807_s7, 4  ;;  %s64_s18 = int_to_ptr.vmem [resolvable:$true] %s63_s18  ;;  %s3975_s25 = int_to_ptr.vmem [resolvable:$true] %s84_s25 }
  0x4b   :  { %s3700_s20 = scalar_lea.hbm %s4370_s6, 16 }
  0x4c   :  { %p3701_p4 = scmp.ne.s32.totalorder %s4370_s6, %s3700_s20  ;;  %p3704_p5 = scmp.lt.u32.totalorder %s3700_s20, %s4370_s6 }
  0x4e   :  { %p3706_p6 = pnand %p3704_p5, %p3701_p4 }
  0x50   :  { %3709 = shalt.err (!%p3706_p6)
}
  0x51   :  { %s3710_s2 = scalar_lea.vmem %s64_s18, 16  ;;  %s3714_s23 = scalar_lea.vmem %s64_s18, 32 }
  0x52   :  { %p3711_p7 = scmp.ne.s32.totalorder %s64_s18, %s3710_s2  ;;  %p3715_p8 = scmp.lt.s32.totalorder %s64_s18, %s64_s18 }
  0x53   :  { %p3716_p9 = scmp.lt.s32.totalorder %s3714_s23, %s3710_s2 }
  0x55   :  { %p3717_p10 = por %p3716_p9, %p3715_p8 }
  0x57   :  { %p3718_p11 = pnand %p3717_p10, %p3711_p7 }
  0x59   :  { %3721 = shalt.err (!%p3718_p11)
}
  0x5a   :  { %66 = dma.hbm_to_vmem [thread:$0]  %s4370_s6, 16, %s64_s18, [#allocation7]  }
  0x5b   :  { %s3722_s30 = scalar_lea.hbm %s4372_s8, 2048 }
  0x5c   :  { %p3723_p12 = scmp.ne.s32.totalorder %s4372_s8, %s3722_s30  ;;  %p3726_p13 = scmp.lt.u32.totalorder %s3722_s30, %s4372_s8 }
  0x5e   :  { %p3728_p0 = pnand %p3726_p13, %p3723_p12 }
  0x60   :  { %3731 = shalt.err (!%p3728_p0)
}
  0x61   :  { %s3732_s22 = scalar_lea.vmem %s3975_s25, 2048  ;;  %p3737_p2 = scmp.lt.s32.totalorder %s3975_s25, %s3975_s25 }
  0x62   :  { %p3733_p1 = scmp.ne.s32.totalorder %s3975_s25, %s3732_s22  ;;  %p3738_p3 = scmp.lt.s32.totalorder %s3732_s22, %s3732_s22 }
  0x64   :  { %p3739_p4 = por %p3738_p3, %p3737_p2 }
  0x66   :  { %p3740_p5 = pnand %p3739_p4, %p3733_p1 }
  0x68   :  { %3743 = shalt.err (!%p3740_p5)
}
  0x69   :  { %s3808_s6 = smov 64   ;;  %s3809_s18 = smov 4  }
  0x6a   :  { %90 = dma.hbm_to_vmem [thread:$0]  %s4372_s8, 2048, %s3975_s25, [#allocation10], %s3808_s6, %s3808_s6, %s3809_s18  }
  0x6b   :  { %s3810_s28 = smov [#allocation14]   ;;  %s3744_s0 = scalar_lea.hbm %s4377_s13, 4096 }
  0x6c   :  { %s114_s2 = sshll.u32 %s3810_s28, 4  ;;  %p3745_p6 = scmp.ne.s32.totalorder %s4377_s13, %s3744_s0  ;;  %s115_s2 = int_to_ptr.vmem [resolvable:$true] %s114_s2 }
  0x6d   :  { %p3748_p7 = scmp.lt.u32.totalorder %s3744_s0, %s4377_s13 }
  0x6f   :  { %p3750_p8 = pnand %p3748_p7, %p3745_p6 }
  0x71   :  { %3753 = shalt.err (!%p3750_p8)
}
  0x72   :  { %s3754_s19 = scalar_lea.vmem %s115_s2, 4096  ;;  %p3759_p10 = scmp.lt.s32.totalorder %s115_s2, %s115_s2 }
  0x73   :  { %p3755_p9 = scmp.ne.s32.totalorder %s115_s2, %s3754_s19  ;;  %p3760_p11 = scmp.lt.s32.totalorder %s3754_s19, %s3754_s19 }
  0x75   :  { %p3761_p12 = por %p3760_p11, %p3759_p10 }
  0x77   :  { %p3762_p13 = pnand %p3761_p12, %p3755_p9 }
  0x79   :  { %3765 = shalt.err (!%p3762_p13)
}
  0x7a   :  { %120 = dma.hbm_to_vmem [thread:$0]  %s4377_s13, 4096, %s115_s2, [#allocation13], %s3808_s6, %s3808_s6, %s3809_s18  }
  0x7b   :  { %3788 = dma.done.wait [#allocation4], 256  }
  0x7c   :  { %3789 = vsyncadd [#allocation4], 4294967040 }
  0x7d   :  { %3790 = dma.done.wait [#allocation7], 80  }
  0x7e   :  { %3791 = vsyncadd [#allocation7], 4294967216 }
  0x7f   :  { %3792 = dma.done.wait [#allocation10], 8192  }
  0x80   :  { %3793 = vsyncadd [#allocation10], 4294959104 }
  0x81   :  { %3794 = dma.done.wait [#allocation13], 8192  }
  0x82   :  { %3795 = vsyncadd [#allocation13], 4294959104  ;;  %v3811_v0 = vmov 0   ;;  %s4386_s22 = sld [smem:[#allocation22_spill]]  ;;  %v2891_v15 = vld [vmem:[#allocation6] ss:$0 sm:$0xff] }
  0x83   :  { %3365 = vset.pattern.permute.xlu1 %v3811_v0  ;;  %3364 = vset.pattern.permute.xlu0 %v3811_v0  ;;  %v2892_v18 = vld [vmem:[#allocation6 + $0x1] ss:$0 sm:$0xff]  ;;  %v2893_v21 = vld [vmem:[#allocation6 + $0x2] ss:$0 sm:$0xff]  ;;  %v2894_v22 = vld [vmem:[#allocation6 + $0x3] ss:$0 sm:$0xff] }
  0x84   :  { %471 = vmatprep.mubr.bf16.mxu0 %v3811_v0  ;;  %v228_v27 = vld [vmem:[#allocation3 + $0x8] sm:$0xff]  ;;  %v227_v28 = vld [vmem:[#allocation3] sm:$0xff]  ;;  %v231_v34 = vld [vmem:[%s4368_s4] sm:$0xff]  ;;  %v3812_v41 = vmov 0.0   ;;  %s4387_s0 = sld [smem:[#allocation21_spill]]  ;;  %s3814_s30 = smov 96  }
  0x85   :  { %v232_v33 = vld [vmem:[%s4368_s4 + $0x8] sm:$0xff]  ;;  %3169 = vmatprep.subr.bf16.mxu1 %v3812_v41  ;;  %v3372_v52 = vld [vmem:[#allocation9 + $0x18] ss:$12 sps:$4 sm:$0xff]   ;;  %v3374_v54 = vld [vmem:[#allocation9 + $0x34] ss:$12 sps:$4 sm:$0xff]   ;;  %s3815_s7 = smov 32  }
  0x86   :  { %v3366_v39 = vld [vmem:[#allocation9 + $0x4] ss:$12 sps:$4 sm:$0xff]   ;;  %v3368_v40 = vld [vmem:[#allocation9] ss:$12 sps:$4 sm:$0xff]   ;;  %v3369_v42 = vld [vmem:[#allocation9 + $0x8] ss:$12 sps:$4 sm:$0xff]  }
  0x87   :  { %v3370_v43 = vld [vmem:[#allocation9 + $0x1c] ss:$12 sps:$4 sm:$0xff]   ;;  %439 = vmatprep.subr.bf16.mxu0 %v3366_v39  ;;  %3170 = vmatpush3.bf16.msra.mxu1 %v3369_v42  ;;  %v3373_v53 = vld [vmem:[#allocation9 + $0x20] ss:$12 sps:$4 sm:$0xff]   ;;  %v3377_v56 = vld [vmem:[#allocation9 + $0x38] ss:$12 sps:$4 sm:$0xff]  }
  0x88   :  { %v149_v1 = vld [vmem:[%s4386_s22] sm:$0xff]  ;;  %v150_v2 = vld [vmem:[%s4386_s22 + $0x8] sm:$0xff]  ;;  %440 = vmatpush1.bf16.msra.mxu0 %v3368_v40  ;;  %3171 = vmatprep.subr.bf16.mxu1 %v3812_v41  ;;  %s3816_s25 = smov [#allocation15]  }
  0x89   :  { %vm170_vm0 = vcmp.eq.s32.totalorder %v149_v1, 1  ;;  %vm151_vm1 = vcmp.eq.s32.totalorder %v149_v1, 0  ;;  %vm171_vm2 = vcmp.eq.s32.totalorder %v150_v2, 1  ;;  %vm152_vm3 = vcmp.eq.s32.totalorder %v150_v2, 0  ;;  %441 = vmatprep.subr.bf16.mxu0 %v3370_v43  ;;  %v3376_v55 = vld [vmem:[#allocation9 + $0x30] ss:$12 sps:$4 sm:$0xff]  }
  0x8a   :  { %v173_v3 = vsel %vm170_vm0, 1, %v3811_v0  ;;  %v154_v4 = vsel %vm151_vm1, 1, %v3811_v0  ;;  %v174_v5 = vsel %vm171_vm2, 1, %v3811_v0  ;;  %v155_v6 = vsel %vm152_vm3, 1, %v3811_v0  ;;  %v3378_v57 = vld [vmem:[#allocation9 + $0x4c] ss:$12 sps:$4 sm:$0xff]  }
  0x8b   :  { %176 = vperm.xlu1 %3365, %v173_v3   ;;  %157 = vperm.xlu0 %3364, %v154_v4   ;;  %vm190_vm4 = vcmp.eq.s32.totalorder %v150_v2, 2  ;;  %vm189_vm5 = vcmp.eq.s32.totalorder %v149_v1, 2  ;;  %vm209_vm6 = vcmp.eq.s32.totalorder %v150_v2, 3  ;;  %vm208_vm7 = vcmp.eq.s32.totalorder %v149_v1, 3  ;;  %v3380_v58 = vld [vmem:[#allocation9 + $0x48] ss:$12 sps:$4 sm:$0xff]  }
  0x8c   :  { %v193_v7 = vsel %vm190_vm4, 1, %v3811_v0  ;;  %v192_v8 = vsel %vm189_vm5, 1, %v3811_v0  ;;  %v212_v9 = vsel %vm209_vm6, 1, %v3811_v0  ;;  %v211_v10 = vsel %vm208_vm7, 1, %v3811_v0  ;;  %442 = vmatpush1.bf16.msra.mxu0 %v3372_v52  ;;  %3172 = vmatpush3.bf16.msra.mxu1 %v3373_v53  ;;  %v3381_v59 = vld [vmem:[#allocation9 + $0x50] ss:$12 sps:$4 sm:$0xff]  }
  0x8d   :  { %3173 = vmatprep.subr.bf16.mxu1 %v3812_v41  ;;  %443 = vmatprep.subr.bf16.mxu0 %v3374_v54  ;;  %v3382_v60 = vld [vmem:[#allocation9 + $0x64] ss:$12 sps:$4 sm:$0xff]   ;;  %v3384_v61 = vld [vmem:[#allocation9 + $0x60] ss:$12 sps:$4 sm:$0xff]   ;;  %v3385_v62 = vld [vmem:[#allocation9 + $0x68] ss:$12 sps:$4 sm:$0xff]  }
  0x8e   :  { %v3386_v63 = vld [vmem:[#allocation9 + $0x7c] ss:$12 sps:$4 sm:$0xff]   ;;  %v3388_v1 = vld [vmem:[#allocation9 + $0x78] ss:$12 sps:$4 sm:$0xff]   ;;  %v3389_v2 = vld [vmem:[#allocation9 + $0x80] ss:$12 sps:$4 sm:$0xff]  }
  0x8f   :  { %179 = vperm.xlu1 %3365, %v174_v5   ;;  %160 = vperm.xlu0 %3364, %v155_v6   ;;  %v3390_v3 = vld [vmem:[#allocation9 + $0x94] ss:$12 sps:$4 sm:$0xff]   ;;  %vm3813_vm0 = vmmov 0   ;;  %v3392_v4 = vld [vmem:[#allocation9 + $0x90] ss:$12 sps:$4 sm:$0xff]   ;;  %vm526_vm1 = vcmask 261120  }
  0x90   :  { %444 = vmatpush1.bf16.msra.mxu0 %v3376_v55  ;;  %3174 = vmatpush3.bf16.msra.mxu1 %v3377_v56  ;;  %v3393_v5 = vld [vmem:[#allocation9 + $0x98] ss:$12 sps:$4 sm:$0xff]   ;;  %vm578_vm2 = vcmask 130048   ;;  %vm781_vm3 = vcmask 523520   ;;  %vm913_vm4 = vcmask 785920   ;;  %vm1045_vm5 = vcmask 1048320  }
  0x91   :  { %3175 = vmatprep.subr.bf16.mxu1 %v3812_v41  ;;  %445 = vmatprep.subr.bf16.mxu0 %v3378_v57  ;;  %v3394_v6 = vld [vmem:[#allocation9 + $0xac] ss:$12 sps:$4 sm:$0xff]   ;;  %v4092_v39 = vld [vmem:[%s4387_s0] sm:$0xff]  ;;  %s2876_s1 = sshll.u32 %s3816_s25, 4  ;;  %s2877_s1 = int_to_ptr.vmem [resolvable:$true] %s2876_s1 }
  0x92   :  { %3185 = vmatprep.mubr.msk.bf16.mxu1 %vm3813_vm0, %v3812_v41  ;;  %s3766_s20 = scalar_lea.vmem %s2877_s1, 256  ;;  %p3771_p1 = scmp.lt.s32.totalorder %s2877_s1, %s2877_s1 }
  0x93   :  { %198 = vperm.xlu1 %3365, %v193_v7   ;;  %195 = vperm.xlu0 %3364, %v192_v8   ;;  %v3396_v7 = vld [vmem:[#allocation9 + $0xa8] ss:$12 sps:$4 sm:$0xff]   ;;  %v3397_v8 = vld [vmem:[#allocation9 + $0xb0] ss:$12 sps:$4 sm:$0xff]   ;;  %p3767_p0 = scmp.ne.s32.totalorder %s2877_s1, %s3766_s20  ;;  %p3772_p2 = scmp.lt.s32.totalorder %s3766_s20, %s3766_s20 }
  0x94   :  { %446 = vmatpush1.bf16.msra.mxu0 %v3380_v58  ;;  %3176 = vmatpush3.bf16.msra.mxu1 %v3381_v59 }
  0x95   :  { %3177 = vmatprep.subr.bf16.mxu1 %v3812_v41  ;;  %447 = vmatprep.subr.bf16.mxu0 %v3382_v60  ;;  %p3773_p3 = por %p3772_p2, %p3771_p1 }
  0x97   :  { %217 = vperm.xlu1 %3365, %v212_v9   ;;  %214 = vperm.xlu0 %3364, %v211_v10   ;;  %p3774_p4 = pnand %p3773_p3, %p3767_p0 }
  0x98   :  { %448 = vmatpush1.bf16.msra.mxu0 %v3384_v61  ;;  %3178 = vmatpush3.bf16.msra.mxu1 %v3385_v62 }
  0x99   :  { %449 = vmatprep.subr.bf16.mxu0 %v3386_v63  ;;  %3179 = vmatprep.subr.bf16.mxu1 %v3812_v41 }
  0x9c   :  { %450 = vmatpush1.bf16.msra.mxu0 %v3388_v1  ;;  %3180 = vmatpush3.bf16.msra.mxu1 %v3389_v2 }
  0x9d   :  { %451 = vmatprep.subr.bf16.mxu0 %v3390_v3  ;;  %3181 = vmatprep.subr.bf16.mxu1 %v3812_v41 }
  0xa0   :  { %452 = vmatpush1.bf16.msra.mxu0 %v3392_v4  ;;  %3182 = vmatpush3.bf16.msra.mxu1 %v3393_v5 }
  0xa1   :  { %453 = vmatprep.subr.bf16.mxu0 %v3394_v6  ;;  %3183 = vmatprep.subr.bf16.mxu1 %v3812_v41 }
  0xa4   :  { %454 = vmatpush1.bf16.msra.mxu0 %v3396_v7  ;;  %3184 = vmatpush3.bf16.msra.mxu1 %v3397_v8 }
  0xa5   :  { %3189 = vmatprep.subr.bf16.mxu1 %v3812_v41  ;;  %3213 = vmatprep.subr.bf16.mxu0 %v3812_v41 }
 0x10a   :  { %v177_v11 = vpop.permute.xlu1 %176  ;;  %v158_v12 = vpop.permute.xlu0 %157 }
 0x10b   :  { %vm162_vm8 = vcmp.eq.s32.totalorder %v158_v12, 1  ;;  %vm181_vm10 = vcmp.eq.s32.totalorder %v177_v11, 1 }
 0x10c   :  { %v168_v19 = vsel %vm162_vm8, %v2891_v15, 0.0 }
 0x10d   :  { %v187_v23 = vsel %vm181_vm10, %v2892_v18, %v168_v19 }
 0x10e   :  { %v180_v13 = vpop.permute.xlu1 %179  ;;  %v161_v14 = vpop.permute.xlu0 %160 }
 0x10f   :  { %vm163_vm9 = vcmp.eq.s32.totalorder %v161_v14, 1  ;;  %vm182_vm11 = vcmp.eq.s32.totalorder %v180_v13, 1 }
 0x110   :  { %v169_v20 = vsel %vm163_vm9, %v2891_v15, 0.0 }
 0x111   :  { %v188_v24 = vsel %vm182_vm11, %v2892_v18, %v169_v20 }
 0x112   :  { %v199_v16 = vpop.permute.xlu1 %198  ;;  %v196_v17 = vpop.permute.xlu0 %195 }
 0x113   :  { %vm201_vm12 = vcmp.eq.s32.totalorder %v199_v16, 1  ;;  %vm200_vm13 = vcmp.eq.s32.totalorder %v196_v17, 1  ;;  %v2895_v17 = vld [vmem:[%s4369_s5] ss:$0 sm:$0xff] }
 0x114   :  { %v207_v29 = vsel %vm201_vm12, %v2893_v21, %v188_v24  ;;  %v206_v30 = vsel %vm200_vm13, %v2893_v21, %v187_v23  ;;  %v2896_v21 = vld [vmem:[#allocation8] ss:$0 sm:$0xff] }
 0x116   :  { %v218_v25 = vpop.permute.xlu1 %217  ;;  %v215_v26 = vpop.permute.xlu0 %214 }
 0x117   :  { %vm220_vm14 = vcmp.eq.s32.totalorder %v218_v25, 1  ;;  %vm219_vm15 = vcmp.eq.s32.totalorder %v215_v26, 1 }
 0x118   :  { %v226_v31 = vsel %vm220_vm14, %v2894_v22, %v207_v29  ;;  %v225_v32 = vsel %vm219_vm15, %v2894_v22, %v206_v30 }
 0x119   :  { %v230_v35 = vadd.f32 %v228_v27, %v226_v31  ;;  %v229_v36 = vadd.f32 %v227_v28, %v225_v32 }
 0x11b   :  { %v234_v37 = vadd.f32 %v232_v33, %v230_v35  ;;  %v233_v38 = vadd.f32 %v231_v34, %v229_v36 }
 0x11d   :  { %239 = vadd.xlane.f32.xlu1 %v234_v37  ;;  %237 = vadd.xlane.f32.xlu0 %v233_v38 }
 0x1aa   :  { %v240_v44 = vpop.xlane.xlu1 %239  ;;  %v238_v45 = vpop.xlane.xlu0 %237 }
 0x1ab   :  { %v243_v46 = vmul.f32 0.0078125, %v240_v44  ;;  %v242_v47 = vmul.f32 0.0078125, %v238_v45  ;;  %v4097_v44 = vld [vmem:[%s4387_s0 + $0x8] sm:$0xff] }
 0x1ad   :  { %v4047_v48 = vsub.f32 %v233_v38, %v242_v47  ;;  %v4049_v49 = vsub.f32 %v234_v37, %v243_v46 }
 0x1af   :  { %v246_v50 = vmul.f32 %v4047_v48, %v4047_v48  ;;  %v247_v51 = vmul.f32 %v4049_v49, %v4049_v49 }
 0x1b1   :  { %248 = vadd.xlane.f32.xlu0 %v246_v50 }
 0x1b5   :  { %250 = vadd.xlane.f32.xlu0 %v247_v51 }
 0x23e   :  { %v249_v9 = vpop.xlane.xlu0 %248 }
 0x23f   :  { %v252_v10 = vmul.f32 0.0078125, %v249_v9 }
 0x241   :  { %v254_v11 = vadd.f32 1e-06, %v252_v10 }
 0x242   :  { %v251_v12 = vpop.xlane.xlu0 %250 }
 0x243   :  { %3526 = vrsqrt.f32 %v254_v11  ;;  %v253_v13 = vmul.f32 0.0078125, %v251_v12 }
 0x245   :  { %v255_v14 = vadd.f32 1e-06, %v253_v13 }
 0x247   :  { %3528 = vrsqrt.f32 %v255_v14 }
 0x24d   :  { %v3527_v15 = vpop.eup %3526 }
 0x24e   :  { %v258_v16 = vmul.f32 %v3527_v15, %v4047_v48 }
 0x250   :  { %v266_v20 = vmul.f32 %v2895_v17, %v258_v16 }
 0x251   :  { %v3529_v18 = vpop.eup %3528 }
 0x252   :  { %v259_v19 = vmul.f32 %v3529_v18, %v4049_v49  ;;  %v4070_v23 = vadd.f32 %v2896_v21, %v266_v20 }
 0x254   :  { %v267_v22 = vmul.f32 %v2895_v17, %v259_v19 }
 0x256   :  { %v4072_v24 = vadd.f32 %v2896_v21, %v267_v22 }
 0x258   :  { %v278_v25 = vpack.c.bf16 %v4072_v24, %v4070_v23 }
 0x25a   :  { %472 = vmatmul.mubr.bf16.vlgmr.msra.gmra.mrb[0].mxu0 %v278_v25  ;;  %3186 = vmatmul.mubr.bf16.vlgmr.msra.gmra.mrb[0].mxu1 %v278_v25 }
 0x25b   :  { %3191 = vmatprep.mubr.msk.bf16.mxu1 %vm3813_vm0, %v3812_v41  ;;  %3215 = vmatprep.mubr.msk.bf16.mxu0 %vm3813_vm0, %v3812_v41 }
 0x32d   :  { %v473_v26 = vpop.f32.mrb[0].mxu0  ;;  %v516_v27 = vpop.f32.mrb[0].mxu1 }
 0x32e   :  { %v475_v28 = vpop.f32.mrb[1].mxu0  ;;  %v3187_v29 = vpop.f32.mrb[1].mxu1 }
 0x32f   :  { %v477_v30 = vpop.f32.mrb[2].mxu0  ;;  %v519_v31 = vpop.f32.mrb[2].mxu1 }
 0x330   :  { %v523_v32 = vpack.c.bf16 %v477_v30, %v473_v26  ;;  %v4080_v33 = vpack.c.bf16 %v519_v31, %v516_v27  ;;  %v479_v34 = vpop.f32.mrb[3].mxu0  ;;  %v3188_v35 = vpop.f32.mrb[3].mxu1 }
 0x331   :  { %v524_v36 = vpack.c.bf16 %v479_v34, %v475_v28 }
 0x333   :  { %v531_v37 = vsel %vm526_vm1, %v524_v36, 0 }
 0x334   :  { %3190 = vmatpush3.bf16.xpose.msra.mxu1 %v531_v37 }
 0x335   :  { %3195 = vmatprep.subr.bf16.mxu1 %v3812_v41 }
 0x33b   :  { %3192 = vmatmul.mubr.msk.bf16.vlgmr.msra.gmra.mrb[4].mxu1 %vm526_vm1, %v523_v32 }
 0x33c   :  { %3196 = vmatpush3.bf16.msra.mxu1 %v4080_v33  ;;  %3197 = vmatprep.mubr.msk.bf16.mxu1 %vm3813_vm0, %v3812_v41 }
 0x33d   :  { %3201 = vmatprep.subr.bf16.mxu1 %v3812_v41 }
 0x40e   :  { %v567_v38 = vpop.f32.mrb[4].mxu1 }
 0x40f   :  { %v574_v40 = vmul.f32 0.17677669, %v567_v38  ;;  %v3193_v42 = vpop.f32.mrb[5].mxu1 }
 0x410   :  { %v570_v43 = vpop.f32.mrb[6].mxu1 }
 0x411   :  { %v575_v45 = vmul.f32 0.17677669, %v570_v43  ;;  %v3194_v46 = vpop.f32.mrb[7].mxu1  ;;  %v576_v47 = vadd.f32 %v574_v40, %v4092_v39 }
 0x413   :  { %v579_v48 = vsel %vm578_vm2, %v576_v47, -inf  ;;  %v577_v49 = vadd.f32 %v575_v45, %v4097_v44 }
 0x414   :  { %580 = vmax.xlane.f32.xlu1 %v579_v48 }
 0x415   :  { %v582_v50 = vsel %vm578_vm2, %v577_v49, -inf }
 0x416   :  { %583 = vmax.xlane.f32.xlu0 %v582_v50 }
 0x4a1   :  { %v581_v51 = vpop.xlane.xlu1 %580 }
 0x4a2   :  { %v585_v52 = vsub.f32 %v576_v47, %v581_v51 }
 0x4a3   :  { %v584_v53 = vpop.xlane.xlu0 %583 }
 0x4a4   :  { %v587_v54 = vmul.f32 1.442695, %v585_v52  ;;  %v586_v55 = vsub.f32 %v577_v49, %v584_v53 }
 0x4a6   :  { %3530 = vpow2.f32 %v587_v54  ;;  %v589_v56 = vmul.f32 1.442695, %v586_v55 }
 0x4a8   :  { %3532 = vpow2.f32 %v589_v56 }
 0x4b0   :  { %v3531_v57 = vpop.eup %3530 }
 0x4b1   :  { %v591_v58 = vsel %vm578_vm2, %v3531_v57, 0.0 }
 0x4b2   :  { %v3533_v59 = vpop.eup %3532  ;;  %592 = vadd.xlane.f32.xlu1 %v591_v58 }
 0x4b3   :  { %v594_v60 = vsel %vm578_vm2, %v3533_v59, 0.0 }
 0x4b4   :  { %595 = vadd.xlane.f32.xlu0 %v594_v60 }
 0x4c3   :  { %652 = vrot.lane.b32.xlu1 %v524_v36, %s3814_s30 }
 0x4c7   :  { %785 = vrot.lane.b32.xlu1 %v524_v36, %s3808_s6 }
 0x4ca   :  { %649 = vrot.lane.b32.xlu0 %v523_v32, %s3814_s30 }
 0x4cb   :  { %783 = vrot.lane.b32.xlu1 %v523_v32, %s3808_s6 }
 0x4ce   :  { %917 = vrot.lane.b32.xlu0 %v524_v36, %s3815_s7 }
 0x4cf   :  { %915 = vrot.lane.b32.xlu1 %v523_v32, %s3815_s7 }
 0x53f   :  { %v593_v61 = vpop.xlane.xlu1 %592 }
 0x540   :  { %3534 = vrcp.f32 %v593_v61 }
 0x541   :  { %v596_v62 = vpop.xlane.xlu0 %595 }
 0x542   :  { %3536 = vrcp.f32 %v596_v62 }
 0x543   :  { %v653_v63 = vpop.permute.xlu1 %652 }
 0x544   :  { %v658_v12 = vsel %vm526_vm1, %v653_v63, 0 }
 0x545   :  { %v650_v1 = vpop.permute.xlu0 %649 }
 0x547   :  { %v786_v2 = vpop.permute.xlu1 %785 }
 0x548   :  { %v791_v3 = vsel %vm526_vm1, %v786_v2, 0 }
 0x549   :  { %3214 = vmatpush3.bf16.xpose.msra.mxu0 %v791_v3  ;;  %v918_v8 = vpop.permute.xlu0 %917 }
 0x54a   :  { %v3535_v4 = vpop.eup %3534  ;;  %3225 = vmatprep.subr.bf16.mxu0 %v3812_v41  ;;  %v923_v11 = vsel %vm526_vm1, %v918_v8, 0 }
 0x54b   :  { %v598_v6 = vmul.f32 %v3535_v4, %v3531_v57  ;;  %v784_v9 = vpop.permute.xlu1 %783 }
 0x54c   :  { %v3537_v5 = vpop.eup %3536 }
 0x54d   :  { %v600_v7 = vmul.f32 %v3537_v5, %v3533_v59 }
 0x54f   :  { %v601_v10 = vpack.c.bf16 %v600_v7, %v598_v6  ;;  %v916_v13 = vpop.permute.xlu1 %915 }
 0x550   :  { %3216 = vmatmul.mubr.msk.bf16.vlgmr.msra.gmra.mrb[4].mxu0 %vm526_vm1, %v784_v9 }
 0x551   :  { %3198 = vmatmul.mubr.msk.bf16.vlgmr.msra.gmra.mrb[8].mxu1 %vm578_vm2, %v601_v10  ;;  %3226 = vmatpush3.bf16.xpose.msra.mxu0 %v923_v11 }
 0x552   :  { %3202 = vmatpush3.bf16.xpose.msra.mxu1 %v658_v12  ;;  %3227 = vmatprep.mubr.msk.bf16.mxu0 %vm3813_vm0, %v3812_v41 }
 0x553   :  { %3203 = vmatprep.mubr.msk.bf16.mxu1 %vm3813_vm0, %v3812_v41  ;;  %3207 = vmatprep.subr.bf16.mxu1 %v3812_v41 }
 0x554   :  { %3237 = vmatprep.subr.bf16.mxu0 %v3812_v41 }
 0x558   :  { %3228 = vmatmul.mubr.msk.bf16.vlgmr.msra.gmra.mrb[8].mxu0 %vm526_vm1, %v916_v13 }
 0x559   :  { %3204 = vmatmul.mubr.msk.bf16.vlgmr.msra.gmra.mrb[12].mxu1 %vm526_vm1, %v650_v1  ;;  %3253 = vmatprep.mubr.msk.bf16.mxu0 %vm3813_vm0, %v3812_v41 }
 0x55a   :  { %3209 = vmatprep.mubr.msk.bf16.mxu1 %vm3813_vm0, %v3812_v41 }
 0x623   :  { %v827_v14 = vpop.f32.mrb[4].mxu0 }
 0x624   :  { %v639_v15 = vpop.f32.mrb[8].mxu1  ;;  %v3217_v16 = vpop.f32.mrb[5].mxu0  ;;  %v834_v28 = vmul.f32 0.17677669, %v827_v14 }
 0x625   :  { %v3199_v17 = vpop.f32.mrb[9].mxu1  ;;  %v830_v18 = vpop.f32.mrb[6].mxu0 }
 0x626   :  { %v642_v19 = vpop.f32.mrb[10].mxu1  ;;  %v3218_v20 = vpop.f32.mrb[7].mxu0  ;;  %v835_v40 = vmul.f32 0.17677669, %v830_v18  ;;  %v836_v45 = vadd.f32 %v834_v28, %v4092_v39 }
 0x627   :  { %v646_v21 = vpack.c.bf16 %v642_v19, %v639_v15  ;;  %v3200_v22 = vpop.f32.mrb[11].mxu1 }
 0x628   :  { %v838_v49 = vsel %vm578_vm2, %v836_v45, -inf  ;;  %v837_v50 = vadd.f32 %v835_v40, %v4097_v44 }
 0x629   :  { %647 = vst.msk [vmem:[#allocation2] sm:$0xff] %vm526_vm1, %v646_v21 }
 0x62a   :  { %v841_v52 = vsel %vm578_vm2, %v837_v50, -inf }
 0x62b   :  { %v959_v25 = vpop.f32.mrb[8].mxu0 }
 0x62c   :  { %v694_v26 = vpop.f32.mrb[12].mxu1  ;;  %v3229_v27 = vpop.f32.mrb[9].mxu0  ;;  %v966_v35 = vmul.f32 0.17677669, %v959_v25 }
 0x62d   :  { %v701_v29 = vmul.f32 0.17677669, %v694_v26  ;;  %v3205_v30 = vpop.f32.mrb[13].mxu1  ;;  %v962_v31 = vpop.f32.mrb[10].mxu0 }
 0x62e   :  { %v697_v32 = vpop.f32.mrb[14].mxu1  ;;  %v3230_v34 = vpop.f32.mrb[11].mxu0  ;;  %v968_v47 = vadd.f32 %v966_v35, %v4092_v39  ;;  %v967_v48 = vmul.f32 0.17677669, %v962_v31 }
 0x62f   :  { %v702_v36 = vmul.f32 0.17677669, %v697_v32  ;;  %v3206_v37 = vpop.f32.mrb[15].mxu1  ;;  %v703_v38 = vadd.f32 %v701_v29, %v4092_v39 }
 0x630   :  { %v970_v51 = vsel %vm578_vm2, %v968_v47, -inf  ;;  %v969_v53 = vadd.f32 %v967_v48, %v4097_v44 }
 0x631   :  { %v705_v42 = vsel %vm578_vm2, %v703_v38, -inf  ;;  %v704_v43 = vadd.f32 %v702_v36, %v4097_v44 }
 0x632   :  { %706 = vmax.xlane.f32.xlu0 %v705_v42  ;;  %v973_v54 = vsel %vm578_vm2, %v969_v53, -inf }
 0x633   :  { %v708_v46 = vsel %vm578_vm2, %v704_v43, -inf }
 0x634   :  { %709 = vmax.xlane.f32.xlu1 %v708_v46 }
 0x636   :  { %839 = vmax.xlane.f32.xlu0 %v838_v49 }
 0x638   :  { %971 = vmax.xlane.f32.xlu1 %v970_v51  ;;  %v3398_v51 = vld [vmem:[#allocation11] sm:$0xff]  }
 0x639   :  { %3238 = vmatpush3.bf16.msra.mxu0 %v3398_v51  ;;  %v3433_v51 = vld [vmem:[#allocation14 + $0x8] sm:$0xff]  }
 0x63a   :  { %842 = vmax.xlane.f32.xlu0 %v841_v52  ;;  %v3399_v52 = vld [vmem:[#allocation11 + $0x8] sm:$0xff]   ;;  %3239 = vmatprep.subr.bf16.mxu0 %v3812_v41 }
 0x63d   :  { %3240 = vmatpush3.bf16.msra.mxu0 %v3399_v52  ;;  %v3434_v52 = vld [vmem:[#allocation14 + $0x50] sm:$0xff]  }
 0x63e   :  { %974 = vmax.xlane.f32.xlu0 %v973_v54  ;;  %3241 = vmatprep.subr.bf16.mxu0 %v3812_v41  ;;  %v3401_v54 = vld [vmem:[#allocation11 + $0x18] sm:$0xff]  }
 0x6bf   :  { %v707_v55 = vpop.xlane.xlu0 %706 }
 0x6c0   :  { %v711_v59 = vsub.f32 %v703_v38, %v707_v55 }
 0x6c1   :  { %v710_v56 = vpop.xlane.xlu1 %709 }
 0x6c2   :  { %v712_v61 = vsub.f32 %v704_v43, %v710_v56  ;;  %v713_v4 = vmul.f32 1.442695, %v711_v59  ;;  %v3402_v56 = vld [vmem:[#allocation11 + $0x20] sm:$0xff]   ;;  %v3403_v59 = vld [vmem:[#allocation11 + $0x28] sm:$0xff]  }
 0x6c3   :  { %v840_v57 = vpop.xlane.xlu0 %839 }
 0x6c4   :  { %v844_v58 = vsub.f32 %v836_v45, %v840_v57  ;;  %v715_v5 = vmul.f32 1.442695, %v712_v61 }
 0x6c5   :  { %v972_v60 = vpop.xlane.xlu1 %971 }
 0x6c6   :  { %v846_v62 = vmul.f32 1.442695, %v844_v58  ;;  %v976_v63 = vsub.f32 %v968_v47, %v972_v60 }
 0x6c7   :  { %v843_v1 = vpop.xlane.xlu0 %842 }
 0x6c8   :  { %3538 = vpow2.f32 %v846_v62  ;;  %v978_v2 = vmul.f32 1.442695, %v976_v63  ;;  %v845_v3 = vsub.f32 %v837_v50, %v843_v1  ;;  %v3404_v63 = vld [vmem:[#allocation11 + $0x30] sm:$0xff]  }
 0x6ca   :  { %3540 = vpow2.f32 %v978_v2  ;;  %v848_v6 = vmul.f32 1.442695, %v845_v3  ;;  %v3405_v3 = vld [vmem:[#allocation11 + $0x38] sm:$0xff]  }
 0x6cb   :  { %v975_v7 = vpop.xlane.xlu0 %974 }
 0x6cc   :  { %3542 = vpow2.f32 %v848_v6  ;;  %v977_v8 = vsub.f32 %v969_v53, %v975_v7  ;;  %v3400_v53 = vld [vmem:[#allocation11 + $0x10] sm:$0xff]  }
 0x6cd   :  { %3544 = vpow2.f32 %v713_v4  ;;  %3242 = vmatpush3.bf16.msra.mxu0 %v3400_v53  ;;  %v3435_v53 = vld [vmem:[#allocation14 + $0x10] sm:$0xff]  }
 0x6ce   :  { %3546 = vpow2.f32 %v715_v5  ;;  %v980_v9 = vmul.f32 1.442695, %v977_v8  ;;  %3243 = vmatprep.subr.bf16.mxu0 %v3812_v41 }
 0x6d0   :  { %3548 = vpow2.f32 %v980_v9 }
 0x6d1   :  { %3244 = vmatpush3.bf16.msra.mxu0 %v3401_v54  ;;  %v3436_v54 = vld [vmem:[#allocation14 + $0x58] sm:$0xff]  }
 0x6d2   :  { %v3539_v10 = vpop.eup %3538  ;;  %3245 = vmatprep.subr.bf16.mxu0 %v3812_v41 }
 0x6d3   :  { %v850_v11 = vsel %vm578_vm2, %v3539_v10, 0.0 }
 0x6d4   :  { %v3541_v12 = vpop.eup %3540  ;;  %851 = vadd.xlane.f32.xlu1 %v850_v11 }
 0x6d5   :  { %v982_v16 = vsel %vm578_vm2, %v3541_v12, 0.0  ;;  %3246 = vmatpush3.bf16.msra.mxu0 %v3402_v56  ;;  %v3438_v56 = vld [vmem:[#allocation14 + $0x60] sm:$0xff]  }
 0x6d6   :  { %v3543_v13 = vpop.eup %3542  ;;  %3247 = vmatprep.subr.bf16.mxu0 %v3812_v41 }
 0x6d7   :  { %v3545_v14 = vpop.eup %3544  ;;  %v853_v15 = vsel %vm578_vm2, %v3543_v13, 0.0 }
 0x6d8   :  { %v3547_v17 = vpop.eup %3546  ;;  %854 = vadd.xlane.f32.xlu0 %v853_v15  ;;  %983 = vadd.xlane.f32.xlu1 %v982_v16  ;;  %v717_v19 = vsel %vm578_vm2, %v3545_v14, 0.0 }
 0x6d9   :  { %v720_v18 = vsel %vm578_vm2, %v3547_v17, 0.0  ;;  %3248 = vmatpush3.bf16.msra.mxu0 %v3403_v59 }
 0x6da   :  { %v3549_v20 = vpop.eup %3548  ;;  %3249 = vmatprep.subr.bf16.mxu0 %v3812_v41 }
 0x6db   :  { %v985_v21 = vsel %vm578_vm2, %v3549_v20, 0.0 }
 0x6dc   :  { %721 = vadd.xlane.f32.xlu0 %v720_v18  ;;  %718 = vadd.xlane.f32.xlu1 %v717_v19 }
 0x6dd   :  { %3250 = vmatpush3.bf16.msra.mxu0 %v3404_v63 }
 0x6de   :  { %3251 = vmatprep.subr.bf16.mxu0 %v3812_v41 }
 0x6e0   :  { %986 = vadd.xlane.f32.xlu0 %v985_v21  ;;  %v3406_v21 = vld [vmem:[#allocation12] ss:$8 sps:$4 sm:$0xff]  }
 0x6e1   :  { %3252 = vmatpush3.bf16.msra.mxu0 %v3405_v3 }
 0x6ed   :  { %729 = vrot.lane.b32.xlu1 %v4080_v33, %s3814_s30 }
 0x6f1   :  { %993 = vrot.lane.b32.xlu1 %v4080_v33, %s3815_s7 }
 0x6f6   :  { %861 = vrot.lane.b32.xlu0 %v4080_v33, %s3808_s6 }
 0x761   :  { %v852_v22 = vpop.xlane.xlu1 %851 }
 0x765   :  { %v855_v25 = vpop.xlane.xlu0 %854  ;;  %v984_v26 = vpop.xlane.xlu1 %983 }
 0x769   :  { %v722_v27 = vpop.xlane.xlu0 %721  ;;  %v719_v28 = vpop.xlane.xlu1 %718 }
 0x76a   :  { %3550 = vrcp.f32 %v722_v27 }
 0x76b   :  { %3552 = vrcp.f32 %v719_v28 }
 0x76c   :  { %3554 = vrcp.f32 %v855_v25  ;;  %v3411_v25 = vld [vmem:[#allocation12 + $0x14] ss:$8 sps:$4 sm:$0xff]  }
 0x76d   :  { %v730_v29 = vpop.permute.xlu1 %729  ;;  %3556 = vrcp.f32 %v852_v22  ;;  %v987_v31 = vpop.xlane.xlu0 %986  ;;  %v3408_v22 = vld [vmem:[#allocation12 + $0x4] ss:$8 sps:$4 sm:$0xff]  }
 0x76e   :  { %3208 = vmatpush3.bf16.msra.mxu1 %v730_v29  ;;  %3558 = vrcp.f32 %v987_v31 }
 0x76f   :  { %3219 = vmatprep.subr.bf16.mxu1 %v3812_v41  ;;  %3560 = vrcp.f32 %v984_v26  ;;  %v3409_v26 = vld [vmem:[#allocation12 + $0x10] ss:$8 sps:$4 sm:$0xff]  }
 0x771   :  { %v862_v37 = vpop.permute.xlu0 %861  ;;  %v994_v46 = vpop.permute.xlu1 %993 }
 0x774   :  { %v3551_v30 = vpop.eup %3550 }
 0x775   :  { %v3553_v32 = vpop.eup %3552  ;;  %v726_v34 = vmul.f32 %v3551_v30, %v3547_v17 }
 0x776   :  { %v724_v35 = vmul.f32 %v3553_v32, %v3545_v14  ;;  %v3555_v36 = vpop.eup %3554 }
 0x777   :  { %v3557_v38 = vpop.eup %3556  ;;  %v859_v40 = vmul.f32 %v3555_v36, %v3543_v13  ;;  %v3415_v36 = vld [vmem:[#allocation12 + $0x30] ss:$8 sps:$4 sm:$0xff]  }
 0x778   :  { %v727_v33 = vpack.c.bf16 %v726_v34, %v724_v35  ;;  %v857_v42 = vmul.f32 %v3557_v38, %v3539_v10  ;;  %v3559_v45 = vpop.eup %3558  ;;  %v3414_v34 = vld [vmem:[#allocation12 + $0x24] ss:$8 sps:$4 sm:$0xff]   ;;  %v3412_v35 = vld [vmem:[#allocation12 + $0x20] ss:$8 sps:$4 sm:$0xff]  }
 0x779   :  { %v3561_v47 = vpop.eup %3560  ;;  %v991_v48 = vmul.f32 %v3559_v45, %v3549_v20  ;;  %v3418_v38 = vld [vmem:[#allocation12 + $0x40] ss:$8 sps:$4 sm:$0xff]  }
 0x77a   :  { %3210 = vmatmul.mubr.msk.bf16.vlgmr.msra.gmra.mrb[16].mxu1 %vm578_vm2, %v727_v33  ;;  %v860_v43 = vpack.c.bf16 %v859_v40, %v857_v42  ;;  %v989_v49 = vmul.f32 %v3561_v47, %v3541_v12  ;;  %v3417_v33 = vld [vmem:[#allocation12 + $0x34] ss:$8 sps:$4 sm:$0xff]   ;;  %v3421_v42 = vld [vmem:[#allocation12 + $0x50] ss:$8 sps:$4 sm:$0xff]   ;;  %v3424_v45 = vld [vmem:[#allocation12 + $0x60] ss:$8 sps:$4 sm:$0xff]  }
 0x77b   :  { %3220 = vmatpush3.bf16.msra.mxu1 %v862_v37  ;;  %3221 = vmatprep.mubr.msk.bf16.mxu1 %vm3813_vm0, %v3812_v41  ;;  %v3420_v37 = vld [vmem:[#allocation12 + $0x44] ss:$8 sps:$4 sm:$0xff]   ;;  %v3423_v40 = vld [vmem:[#allocation12 + $0x54] ss:$8 sps:$4 sm:$0xff]   ;;  %v3427_v47 = vld [vmem:[#allocation12 + $0x70] ss:$8 sps:$4 sm:$0xff]  }
 0x77c   :  { %3231 = vmatprep.subr.bf16.mxu1 %v3812_v41  ;;  %v992_v50 = vpack.c.bf16 %v991_v48, %v989_v49  ;;  %v3430_v48 = vld [vmem:[#allocation14 + $0x40] sm:$0xff]  }
 0x77d   :  { %v3431_v49 = vld [vmem:[#allocation14] sm:$0xff]   ;;  %3091 = vmatprep.subr.bf16.mxu0 %v3430_v48 }
 0x782   :  { %3222 = vmatmul.mubr.msk.bf16.vlgmr.msra.gmra.mrb[20].mxu1 %vm578_vm2, %v860_v43  ;;  %v3426_v43 = vld [vmem:[#allocation12 + $0x64] ss:$8 sps:$4 sm:$0xff]  }
 0x783   :  { %3232 = vmatpush3.bf16.msra.mxu1 %v994_v46  ;;  %3233 = vmatprep.mubr.msk.bf16.mxu1 %vm3813_vm0, %v3812_v41  ;;  %v3429_v46 = vld [vmem:[#allocation12 + $0x74] ss:$8 sps:$4 sm:$0xff]  }
 0x784   :  { %1304 = vmatprep.subr.bf16.mxu1 %v3408_v22 }
 0x78a   :  { %3234 = vmatmul.mubr.msk.bf16.vlgmr.msra.gmra.mrb[24].mxu1 %vm578_vm2, %v992_v50  ;;  %v3432_v50 = vld [vmem:[#allocation14 + $0x48] sm:$0xff]  }
 0x78b   :  { %1336 = vmatprep.mubr.bf16.mxu1 %v3811_v0  ;;  %1305 = vmatpush1.bf16.msra.mxu1 %v3406_v21  ;;  %v1212_v21 = vld [vmem:[%s4376_s12] sm:$0x3] }
 0x78c   :  { %1306 = vmatprep.subr.bf16.mxu1 %v3411_v25 }
 0x78f   :  { %1307 = vmatpush1.bf16.msra.mxu1 %v3409_v26 }
 0x790   :  { %1308 = vmatprep.subr.bf16.mxu1 %v3414_v34 }
 0x793   :  { %1309 = vmatpush1.bf16.msra.mxu1 %v3412_v35 }
 0x794   :  { %1310 = vmatprep.subr.bf16.mxu1 %v3417_v33 }
 0x797   :  { %1311 = vmatpush1.bf16.msra.mxu1 %v3415_v36 }
 0x798   :  { %1312 = vmatprep.subr.bf16.mxu1 %v3420_v37 }
 0x79b   :  { %1313 = vmatpush1.bf16.msra.mxu1 %v3418_v38 }
 0x79c   :  { %1314 = vmatprep.subr.bf16.mxu1 %v3423_v40 }
 0x79f   :  { %1315 = vmatpush1.bf16.msra.mxu1 %v3421_v42  ;;  %v2955_v42 = vld [vmem:[%s4378_s14] ss:$0 sm:$0xff] }
 0x7a0   :  { %1316 = vmatprep.subr.bf16.mxu1 %v3426_v43 }
 0x7a3   :  { %1317 = vmatpush1.bf16.msra.mxu1 %v3424_v45 }
 0x7a4   :  { %1318 = vmatprep.subr.bf16.mxu1 %v3429_v46 }
 0x7a7   :  { %1319 = vmatpush1.bf16.msra.mxu1 %v3427_v47 }
 0x84d   :  { %v769_v55 = vpop.f32.mrb[16].mxu1 }
 0x84e   :  { %v3211_v57 = vpop.f32.mrb[17].mxu1 }
 0x84f   :  { %v772_v58 = vpop.f32.mrb[18].mxu1  ;;  %v3439_v57 = vld [vmem:[#allocation14 + $0x20] sm:$0xff]  }
 0x850   :  { %v776_v60 = vpack.c.bf16 %v772_v58, %v769_v55  ;;  %v3212_v61 = vpop.f32.mrb[19].mxu1  ;;  %v3437_v55 = vld [vmem:[#allocation14 + $0x18] sm:$0xff]   ;;  %v3440_v58 = vld [vmem:[#allocation14 + $0x68] sm:$0xff]  }
 0x852   :  { %778 = vrot.lane.b32.xlu1 %v776_v60, %s3815_s7 }
 0x855   :  { %v901_v62 = vpop.f32.mrb[20].mxu1 }
 0x856   :  { %v3223_v1 = vpop.f32.mrb[21].mxu1 }
 0x857   :  { %v904_v2 = vpop.f32.mrb[22].mxu1 }
 0x858   :  { %v908_v4 = vpack.c.bf16 %v904_v2, %v901_v62  ;;  %v3224_v5 = vpop.f32.mrb[23].mxu1 }
 0x85a   :  { %910 = vrot.lane.b32.xlu0 %v908_v4, %s3808_s6  ;;  %v2937_v4 = vld [vmem:[%s4373_s9] ss:$0 sm:$0xff] }
 0x85d   :  { %v1033_v6 = vpop.f32.mrb[24].mxu1 }
 0x85e   :  { %v3235_v7 = vpop.f32.mrb[25].mxu1 }
 0x85f   :  { %v1036_v8 = vpop.f32.mrb[26].mxu1 }
 0x860   :  { %v1040_v9 = vpack.c.bf16 %v1036_v8, %v1033_v6  ;;  %v3236_v10 = vpop.f32.mrb[27].mxu1  ;;  %v2938_v8 = vld [vmem:[%s4374_s10] ss:$0 sm:$0xff] }
 0x862   :  { %1042 = vrot.lane.b32.xlu1 %v1040_v9, %s3814_s30 }
 0x8c4   :  { %v779_v11 = vpop.permute.xlu1 %778 }
 0x8c5   :  { %782 = vst.msk [vmem:[#allocation2] sm:$0xff] %vm781_vm3, %v779_v11 }
 0x8cc   :  { %v911_v12 = vpop.permute.xlu0 %910 }
 0x8cd   :  { %914 = vst.msk [vmem:[#allocation2] sm:$0xff] %vm913_vm4, %v911_v12 }
 0x8d4   :  { %v1043_v13 = vpop.permute.xlu1 %1042 }
 0x8d5   :  { %1046 = vst.msk [vmem:[#allocation2] sm:$0xff] %vm1045_vm5, %v1043_v13  ;;  %v3441_v13 = vld [vmem:[#allocation14 + $0x28] sm:$0xff]  }
 0x8dc   :  { %v1047_v14 = vld [vmem:[#allocation2] sm:$0xff] }
 0x8dd   :  { %3254 = vmatmul.mubr.bf16.vlgmr.msra.gmra.mrb[12].mxu0 %v1047_v14  ;;  %v3442_v14 = vld [vmem:[#allocation14 + $0x70] sm:$0xff]  }
 0x8de   :  { %3092 = vmatpush3.bf16.msra.mxu0 %v3431_v49 }
 0x8df   :  { %3093 = vmatprep.subr.bf16.mxu0 %v3432_v50 }
 0x8e2   :  { %3094 = vmatpush3.bf16.msra.mxu0 %v3433_v51 }
 0x8e3   :  { %3095 = vmatprep.subr.bf16.mxu0 %v3434_v52 }
 0x8e6   :  { %3096 = vmatpush3.bf16.msra.mxu0 %v3435_v53  ;;  %v3446_v53 = vld [vmem:[#allocation9 + $0xc0] ss:$12 sps:$4 sm:$0xff]  }
 0x8e7   :  { %3097 = vmatprep.subr.bf16.mxu0 %v3436_v54  ;;  %v3448_v54 = vld [vmem:[#allocation9 + $0xc4] ss:$12 sps:$4 sm:$0xff]  }
 0x8e8   :  { %1733 = vmatprep.subr.bf16.mxu1 %v3448_v54 }
 0x8ea   :  { %3098 = vmatpush3.bf16.msra.mxu0 %v3437_v55  ;;  %v3449_v55 = vld [vmem:[#allocation9 + $0xc8] ss:$12 sps:$4 sm:$0xff]  }
 0x8eb   :  { %3099 = vmatprep.subr.bf16.mxu0 %v3438_v56  ;;  %v3452_v56 = vld [vmem:[#allocation9 + $0xdc] ss:$12 sps:$4 sm:$0xff]  }
 0x8ee   :  { %3100 = vmatpush3.bf16.msra.mxu0 %v3439_v57  ;;  %v3453_v57 = vld [vmem:[#allocation9 + $0xe0] ss:$12 sps:$4 sm:$0xff]  }
 0x8ef   :  { %3101 = vmatprep.subr.bf16.mxu0 %v3440_v58  ;;  %v3450_v58 = vld [vmem:[#allocation9 + $0xd8] ss:$12 sps:$4 sm:$0xff]  }
 0x8f2   :  { %3102 = vmatpush3.bf16.msra.mxu0 %v3441_v13  ;;  %v3468_v13 = vld [vmem:[#allocation9 + $0x13c] ss:$12 sps:$4 sm:$0xff]  }
 0x8f3   :  { %3103 = vmatprep.subr.bf16.mxu0 %v3442_v14  ;;  %v3466_v14 = vld [vmem:[#allocation9 + $0x138] ss:$12 sps:$4 sm:$0xff]  }
 0x9b0   :  { %v1146_v15 = vpop.f32.mrb[12].mxu0 }
 0x9b1   :  { %v1153_v16 = vadd.f32 %v1146_v15, %v4070_v23  ;;  %v3255_v17 = vpop.f32.mrb[13].mxu0  ;;  %v3443_v15 = vld [vmem:[#allocation14 + $0x30] sm:$0xff]  }
 0x9b2   :  { %v1149_v18 = vpop.f32.mrb[14].mxu0  ;;  %3104 = vmatpush3.bf16.msra.mxu0 %v3443_v15  ;;  %v3445_v17 = vld [vmem:[#allocation14 + $0x38] sm:$0xff]   ;;  %v3469_v15 = vld [vmem:[#allocation9 + $0x140] ss:$12 sps:$4 sm:$0xff]  }
 0x9b3   :  { %v1154_v19 = vadd.f32 %v1149_v18, %v4072_v24  ;;  %1157 = vadd.xlane.f32.xlu0 %v1153_v16  ;;  %v3256_v20 = vpop.f32.mrb[15].mxu0  ;;  %v1214_v18 = vlaneseq }
 0x9b5   :  { %1159 = vadd.xlane.f32.xlu1 %v1154_v19 }
 0xa40   :  { %v1158_v27 = vpop.xlane.xlu0 %1157 }
 0xa41   :  { %v1161_v28 = vmul.f32 0.0078125, %v1158_v27 }
 0xa42   :  { %v1160_v29 = vpop.xlane.xlu1 %1159 }
 0xa43   :  { %v1163_v30 = vsub.f32 %v1153_v16, %v1161_v28  ;;  %v1162_v23 = vmul.f32 0.0078125, %v1160_v29  ;;  %v3444_v16 = vld [vmem:[#allocation14 + $0x78] sm:$0xff]  }
 0xa44   :  { %3105 = vmatprep.subr.bf16.mxu0 %v3444_v16  ;;  %v3472_v16 = vld [vmem:[#allocation9 + $0x154] ss:$12 sps:$4 sm:$0xff]  }
 0xa45   :  { %v4179_v31 = vsub.f32 %v1154_v19, %v1162_v23  ;;  %v1165_v32 = vmul.f32 %v1163_v30, %v1163_v30  ;;  %3106 = vmatpush3.bf16.msra.mxu0 %v3445_v17  ;;  %v4192_v19 = vshrl.u32 %v1214_v18, 7  ;;  %v3470_v17 = vld [vmem:[#allocation9 + $0x150] ss:$12 sps:$4 sm:$0xff]   ;;  %v3473_v18 = vld [vmem:[#allocation9 + $0x158] ss:$12 sps:$4 sm:$0xff]  }
 0xa46   :  { %3257 = vmatprep.subr.bf16.mxu0 %v3812_v41 }
 0xa47   :  { %1167 = vadd.xlane.f32.xlu0 %v1165_v32  ;;  %v1166_v24 = vmul.f32 %v4179_v31, %v4179_v31  ;;  %v1216_v20 = vsub.s32 0, %v4192_v19  ;;  %v1220_v22 = vsub.s32 1, %v4192_v19  ;;  %v3036_v19 = vld [vmem:[%s4378_s14 + $0x1] ss:$0 sm:$0xff] }
 0xa49   :  { %v1217_v25 = vrot.slane %v1212_v21, %v1216_v20  ;;  %v1221_v26 = vrot.slane %v1212_v21, %v1220_v22  ;;  %v3476_v21 = vld [vmem:[#allocation9 + $0x16c] ss:$12 sps:$4 sm:$0xff]  }
 0xa4b   :  { %1169 = vadd.xlane.f32.xlu0 %v1166_v24 }
 0xad4   :  { %v1168_v59 = vpop.xlane.xlu0 %1167 }
 0xad5   :  { %v1171_v60 = vmul.f32 0.0078125, %v1168_v59 }
 0xad7   :  { %v1173_v61 = vadd.f32 1e-06, %v1171_v60 }
 0xad8   :  { %v1170_v62 = vpop.xlane.xlu0 %1169 }
 0xad9   :  { %3562 = vrsqrt.f32 %v1173_v61  ;;  %v1172_v63 = vmul.f32 0.0078125, %v1170_v62 }
 0xadb   :  { %v1174_v1 = vadd.f32 1e-06, %v1172_v63 }
 0xadd   :  { %3564 = vrsqrt.f32 %v1174_v1 }
 0xae3   :  { %v3563_v2 = vpop.eup %3562 }
 0xae4   :  { %v1177_v3 = vmul.f32 %v3563_v2, %v1163_v30 }
 0xae6   :  { %v1185_v7 = vmul.f32 %v2937_v4, %v1177_v3 }
 0xae7   :  { %v3565_v5 = vpop.eup %3564 }
 0xae8   :  { %v1178_v6 = vmul.f32 %v3565_v5, %v4179_v31  ;;  %v1193_v10 = vadd.f32 %v2938_v8, %v1185_v7  ;;  %v3454_v5 = vld [vmem:[#allocation9 + $0xf0] ss:$12 sps:$4 sm:$0xff]   ;;  %v3460_v7 = vld [vmem:[#allocation9 + $0x10c] ss:$12 sps:$4 sm:$0xff]  }
 0xaea   :  { %v1186_v9 = vmul.f32 %v2937_v4, %v1178_v6  ;;  %v3456_v4 = vld [vmem:[#allocation9 + $0xf4] ss:$12 sps:$4 sm:$0xff]   ;;  %v3457_v6 = vld [vmem:[#allocation9 + $0xf8] ss:$12 sps:$4 sm:$0xff]  }
 0xaec   :  { %v1194_v11 = vadd.f32 %v2938_v8, %v1186_v9  ;;  %v3458_v8 = vld [vmem:[#allocation9 + $0x108] ss:$12 sps:$4 sm:$0xff]   ;;  %v3461_v9 = vld [vmem:[#allocation9 + $0x110] ss:$12 sps:$4 sm:$0xff]  }
 0xaee   :  { %v1195_v12 = vpack.c.bf16 %v1194_v11, %v1193_v10 }
 0xaf0   :  { %1337 = vmatmul.mubr.bf16.vlgmr.msra.gmra.mrb[28].mxu1 %v1195_v12  ;;  %v3465_v12 = vld [vmem:[#allocation9 + $0x128] ss:$12 sps:$4 sm:$0xff]  }
 0xaf1   :  { %1765 = vmatprep.mubr.bf16.mxu1 %v3811_v0  ;;  %1734 = vmatpush1.bf16.msra.mxu1 %v3446_v53 }
 0xaf2   :  { %1735 = vmatprep.subr.bf16.mxu1 %v3452_v56 }
 0xaf5   :  { %1736 = vmatpush1.bf16.msra.mxu1 %v3450_v58 }
 0xaf6   :  { %1737 = vmatprep.subr.bf16.mxu1 %v3456_v4 }
 0xaf9   :  { %1738 = vmatpush1.bf16.msra.mxu1 %v3454_v5 }
 0xafa   :  { %1739 = vmatprep.subr.bf16.mxu1 %v3460_v7 }
 0xafd   :  { %1740 = vmatpush1.bf16.msra.mxu1 %v3458_v8 }
 0xbc3   :  { %v1338_v27 = vpop.f32.mrb[28].mxu1 }
 0xbc4   :  { %v1339_v28 = vadd.f32 %v1338_v27, %v1217_v25  ;;  %v1340_v29 = vpop.f32.mrb[29].mxu1 }
 0xbc5   :  { %v1341_v30 = vadd.f32 %v1340_v29, %v1221_v26  ;;  %v1342_v23 = vpop.f32.mrb[30].mxu1 }
 0xbc6   :  { %v1343_v31 = vadd.f32 %v1342_v23, %v1217_v25  ;;  %v1344_v32 = vpop.f32.mrb[31].mxu1  ;;  %v1347_v34 = vmax.f32 %v1339_v28, 0.0  ;;  %v3474_v25 = vld [vmem:[#allocation9 + $0x168] ss:$12 sps:$4 sm:$0xff]  }
 0xbc7   :  { %v1345_v24 = vadd.f32 %v1344_v32, %v1221_v26  ;;  %v1348_v33 = vmax.f32 %v1341_v30, 0.0  ;;  %v3477_v26 = vld [vmem:[#allocation9 + $0x170] ss:$12 sps:$4 sm:$0xff]  }
 0xbc8   :  { %v1349_v35 = vmax.f32 %v1343_v31, 0.0 }
 0xbc9   :  { %v1350_v36 = vmax.f32 %v1345_v24, 0.0  ;;  %v2972_v24 = vld [vmem:[%s4379_s15] ss:$0 sm:$0xff] }
 0xbca   :  { %v1351_v37 = vpack.c.bf16 %v1349_v35, %v1347_v34 }
 0xbcb   :  { %v1352_v38 = vpack.c.bf16 %v1350_v36, %v1348_v33 }
 0xbcd   :  { %1520 = vmatprep.mubr.bf16.mxu0 %v1352_v38 }
 0xbce   :  { %1521 = vmatmul.mubr.bf16.vlgmr.msra.gmra.mrb[16].mxu0 %v1351_v37  ;;  %v2973_v37 = vld [vmem:[%s4380_s16] ss:$0 sm:$0xff] }
 0xbcf   :  { %3273 = vmatprep.mubr.msk.bf16.mxu0 %vm3813_vm0, %v3812_v41  ;;  %3258 = vmatpush3.bf16.msra.mxu0 %v3449_v55 }
 0xbd0   :  { %3259 = vmatprep.subr.bf16.mxu0 %v3812_v41 }
 0xbd3   :  { %3260 = vmatpush3.bf16.msra.mxu0 %v3453_v57 }
 0xbd4   :  { %3261 = vmatprep.subr.bf16.mxu0 %v3812_v41 }
 0xbd7   :  { %3262 = vmatpush3.bf16.msra.mxu0 %v3457_v6 }
 0xbd8   :  { %3263 = vmatprep.subr.bf16.mxu0 %v3812_v41 }
 0xbdb   :  { %3264 = vmatpush3.bf16.msra.mxu0 %v3461_v9 }
 0xbdc   :  { %3265 = vmatprep.subr.bf16.mxu0 %v3812_v41 }
 0xbdf   :  { %3266 = vmatpush3.bf16.msra.mxu0 %v3465_v12 }
 0xbe0   :  { %3267 = vmatprep.subr.bf16.mxu0 %v3812_v41 }
 0xbe3   :  { %3268 = vmatpush3.bf16.msra.mxu0 %v3469_v15 }
 0xbe4   :  { %3269 = vmatprep.subr.bf16.mxu0 %v3812_v41 }
 0xbe7   :  { %3270 = vmatpush3.bf16.msra.mxu0 %v3473_v18 }
 0xbe8   :  { %3271 = vmatprep.subr.bf16.mxu0 %v3812_v41 }
 0xbeb   :  { %3272 = vmatpush3.bf16.msra.mxu0 %v3477_v26 }
 0xbec   :  { %3301 = vmatprep.subr.bf16.mxu0 %v3812_v41 }
 0xca1   :  { %v3107_v40 = vpop.f32.mrb[16].mxu0 }
 0xca2   :  { %v3108_v43 = vpop.f32.mrb[17].mxu0 }
 0xca3   :  { %v3109_v45 = vadd.f32 %v3108_v43, %v3107_v40  ;;  %v3110_v46 = vpop.f32.mrb[18].mxu0 }
 0xca4   :  { %v3111_v47 = vpop.f32.mrb[19].mxu0 }
 0xca5   :  { %v1523_v48 = vadd.f32 %v3109_v45, %v2955_v42  ;;  %v3112_v49 = vadd.f32 %v3111_v47, %v3110_v46 }
 0xca7   :  { %v1526_v50 = vadd.f32 %v3112_v49, %v2955_v42  ;;  %v1529_v51 = vadd.f32 %v1523_v48, %v1193_v10  ;;  %v3464_v10 = vld [vmem:[#allocation9 + $0x124] ss:$12 sps:$4 sm:$0xff]  }
 0xca8   :  { %1741 = vmatprep.subr.bf16.mxu1 %v3464_v10 }
 0xca9   :  { %1533 = vadd.xlane.f32.xlu1 %v1529_v51  ;;  %v1530_v52 = vadd.f32 %v1526_v50, %v1194_v11  ;;  %v3462_v11 = vld [vmem:[#allocation9 + $0x120] ss:$12 sps:$4 sm:$0xff]  }
 0xcaa   :  { %1742 = vmatpush1.bf16.msra.mxu1 %v3462_v11 }
 0xcab   :  { %1535 = vadd.xlane.f32.xlu0 %v1530_v52  ;;  %1743 = vmatprep.subr.bf16.mxu1 %v3468_v13 }
 0xcae   :  { %1744 = vmatpush1.bf16.msra.mxu1 %v3466_v14 }
 0xcaf   :  { %1745 = vmatprep.subr.bf16.mxu1 %v3472_v16 }
 0xcb2   :  { %1746 = vmatpush1.bf16.msra.mxu1 %v3470_v17 }
 0xcb3   :  { %1747 = vmatprep.subr.bf16.mxu1 %v3476_v21 }
 0xcb6   :  { %1748 = vmatpush1.bf16.msra.mxu1 %v3474_v25 }
 0xcb7   :  { %3277 = vmatprep.subr.bf16.mxu1 %v3812_v41 }
 0xd36   :  { %v1534_v59 = vpop.xlane.xlu1 %1533 }
 0xd37   :  { %v1537_v60 = vmul.f32 0.0078125, %v1534_v59 }
 0xd38   :  { %v1536_v61 = vpop.xlane.xlu0 %1535 }
 0xd39   :  { %v1539_v62 = vsub.f32 %v1529_v51, %v1537_v60  ;;  %v1538_v63 = vmul.f32 0.0078125, %v1536_v61 }
 0xd3b   :  { %v1540_v1 = vsub.f32 %v1530_v52, %v1538_v63  ;;  %v1541_v2 = vmul.f32 %v1539_v62, %v1539_v62 }
 0xd3d   :  { %1543 = vadd.xlane.f32.xlu1 %v1541_v2  ;;  %v1542_v3 = vmul.f32 %v1540_v1, %v1540_v1 }
 0xd3f   :  { %1545 = vadd.xlane.f32.xlu0 %v1542_v3 }
 0xdca   :  { %v1544_v27 = vpop.xlane.xlu1 %1543 }
 0xdcb   :  { %v1547_v28 = vmul.f32 0.0078125, %v1544_v27 }
 0xdcc   :  { %v1546_v29 = vpop.xlane.xlu0 %1545 }
 0xdcd   :  { %v1549_v30 = vadd.f32 1e-06, %v1547_v28  ;;  %v1548_v23 = vmul.f32 0.0078125, %v1546_v29 }
 0xdcf   :  { %3566 = vrsqrt.f32 %v1549_v30  ;;  %v1550_v31 = vadd.f32 1e-06, %v1548_v23 }
 0xdd1   :  { %3568 = vrsqrt.f32 %v1550_v31 }
 0xdd9   :  { %v3567_v32 = vpop.eup %3566 }
 0xdda   :  { %v1553_v34 = vmul.f32 %v3567_v32, %v1539_v62 }
 0xddb   :  { %v3569_v35 = vpop.eup %3568 }
 0xddc   :  { %v1554_v33 = vmul.f32 %v3569_v35, %v1540_v1  ;;  %v1561_v36 = vmul.f32 %v2972_v24, %v1553_v34 }
 0xdde   :  { %v1562_v38 = vmul.f32 %v2972_v24, %v1554_v33  ;;  %v4223_v40 = vadd.f32 %v2973_v37, %v1561_v36 }
 0xde0   :  { %v4225_v42 = vadd.f32 %v2973_v37, %v1562_v38 }
 0xde2   :  { %v1571_v43 = vpack.c.bf16 %v4225_v42, %v4223_v40 }
 0xde4   :  { %1766 = vmatmul.mubr.bf16.vlgmr.msra.gmra.mrb[32].mxu1 %v1571_v43  ;;  %3274 = vmatmul.mubr.bf16.vlgmr.msra.gmra.mrb[20].mxu0 %v1571_v43 }
 0xde5   :  { %3279 = vmatprep.mubr.msk.bf16.mxu1 %vm3813_vm0, %v3812_v41  ;;  %3303 = vmatprep.mubr.msk.bf16.mxu0 %vm3813_vm0, %v3812_v41 }
 0xeb7   :  { %v1767_v45 = vpop.f32.mrb[32].mxu1  ;;  %v1810_v46 = vpop.f32.mrb[20].mxu0 }
 0xeb8   :  { %v1769_v47 = vpop.f32.mrb[33].mxu1  ;;  %v3275_v48 = vpop.f32.mrb[21].mxu0 }
 0xeb9   :  { %v1771_v49 = vpop.f32.mrb[34].mxu1  ;;  %v1813_v50 = vpop.f32.mrb[22].mxu0 }
 0xeba   :  { %v1817_v51 = vpack.c.bf16 %v1771_v49, %v1767_v45  ;;  %v4233_v52 = vpack.c.bf16 %v1813_v50, %v1810_v46  ;;  %v1773_v53 = vpop.f32.mrb[35].mxu1  ;;  %v3276_v54 = vpop.f32.mrb[23].mxu0 }
 0xebb   :  { %v1818_v55 = vpack.c.bf16 %v1773_v53, %v1769_v47 }
 0xebd   :  { %v1824_v56 = vsel %vm526_vm1, %v1818_v55, 0 }
 0xebe   :  { %3278 = vmatpush3.bf16.xpose.msra.mxu1 %v1824_v56 }
 0xebf   :  { %3283 = vmatprep.subr.bf16.mxu1 %v3812_v41 }
 0xec5   :  { %3280 = vmatmul.mubr.msk.bf16.vlgmr.msra.gmra.mrb[36].mxu1 %vm526_vm1, %v1817_v51 }
 0xec6   :  { %3284 = vmatpush3.bf16.msra.mxu1 %v4233_v52  ;;  %3285 = vmatprep.mubr.msk.bf16.mxu1 %vm3813_vm0, %v3812_v41 }
 0xec7   :  { %3289 = vmatprep.subr.bf16.mxu1 %v3812_v41 }
 0xf98   :  { %v1860_v57 = vpop.f32.mrb[36].mxu1 }
 0xf99   :  { %v1867_v58 = vmul.f32 0.17677669, %v1860_v57  ;;  %v3281_v59 = vpop.f32.mrb[37].mxu1 }
 0xf9a   :  { %v1863_v60 = vpop.f32.mrb[38].mxu1 }
 0xf9b   :  { %v1868_v61 = vmul.f32 0.17677669, %v1863_v60  ;;  %v3282_v62 = vpop.f32.mrb[39].mxu1  ;;  %v1869_v63 = vadd.f32 %v1867_v58, %v4092_v39  ;;  %v3610_v58 = vld [vmem:[%s4387_s0] sm:$0xff] }
 0xf9c   :  { %v3611_v62 = vld [vmem:[%s4387_s0 + $0x8] sm:$0xff] }
 0xf9d   :  { %v1871_v1 = vsel %vm578_vm2, %v1869_v63, -inf  ;;  %v1870_v2 = vadd.f32 %v1868_v61, %v4097_v44 }
 0xf9e   :  { %1872 = vmax.xlane.f32.xlu1 %v1871_v1 }
 0xf9f   :  { %v1874_v3 = vsel %vm578_vm2, %v1870_v2, -inf }
 0xfa0   :  { %1875 = vmax.xlane.f32.xlu0 %v1874_v3 }
0x102b   :  { %v1873_v4 = vpop.xlane.xlu1 %1872 }
0x102c   :  { %v1877_v5 = vsub.f32 %v1869_v63, %v1873_v4 }
0x102d   :  { %v1876_v6 = vpop.xlane.xlu0 %1875 }
0x102e   :  { %v1879_v7 = vmul.f32 1.442695, %v1877_v5  ;;  %v1878_v8 = vsub.f32 %v1870_v2, %v1876_v6 }
0x1030   :  { %3570 = vpow2.f32 %v1879_v7  ;;  %v1881_v9 = vmul.f32 1.442695, %v1878_v8 }
0x1032   :  { %3572 = vpow2.f32 %v1881_v9 }
0x103a   :  { %v3571_v10 = vpop.eup %3570 }
0x103b   :  { %v1883_v11 = vsel %vm578_vm2, %v3571_v10, 0.0 }
0x103c   :  { %v3573_v39 = vpop.eup %3572  ;;  %1884 = vadd.xlane.f32.xlu1 %v1883_v11 }
0x103d   :  { %v1886_v12 = vsel %vm578_vm2, %v3573_v39, 0.0 }
0x103e   :  { %1887 = vadd.xlane.f32.xlu0 %v1886_v12 }
0x104d   :  { %1944 = vrot.lane.b32.xlu1 %v1818_v55, %s3814_s30 }
0x1051   :  { %2076 = vrot.lane.b32.xlu1 %v1818_v55, %s3808_s6 }
0x1054   :  { %1941 = vrot.lane.b32.xlu0 %v1817_v51, %s3814_s30 }
0x1055   :  { %2074 = vrot.lane.b32.xlu1 %v1817_v51, %s3808_s6 }
0x1058   :  { %2207 = vrot.lane.b32.xlu0 %v1818_v55, %s3815_s7 }
0x1059   :  { %2205 = vrot.lane.b32.xlu1 %v1817_v51, %s3815_s7 }
0x10c9   :  { %v1885_v44 = vpop.xlane.xlu1 %1884 }
0x10ca   :  { %3574 = vrcp.f32 %v1885_v44 }
0x10cb   :  { %v1888_v13 = vpop.xlane.xlu0 %1887 }
0x10cc   :  { %3576 = vrcp.f32 %v1888_v13 }
0x10cd   :  { %v1945_v14 = vpop.permute.xlu1 %1944 }
0x10ce   :  { %v1950_v23 = vsel %vm526_vm1, %v1945_v14, 0 }
0x10cf   :  { %v1942_v15 = vpop.permute.xlu0 %1941 }
0x10d1   :  { %v2077_v16 = vpop.permute.xlu1 %2076 }
0x10d2   :  { %v2082_v17 = vsel %vm526_vm1, %v2077_v16, 0 }
0x10d3   :  { %3302 = vmatpush3.bf16.xpose.msra.mxu0 %v2082_v17  ;;  %v2208_v27 = vpop.permute.xlu0 %2207 }
0x10d4   :  { %v3575_v18 = vpop.eup %3574  ;;  %3313 = vmatprep.subr.bf16.mxu0 %v3812_v41  ;;  %v2213_v30 = vsel %vm526_vm1, %v2208_v27, 0 }
0x10d5   :  { %v1890_v25 = vmul.f32 %v3575_v18, %v3571_v10  ;;  %v2075_v28 = vpop.permute.xlu1 %2074 }
0x10d6   :  { %v3577_v21 = vpop.eup %3576 }
0x10d7   :  { %v1892_v26 = vmul.f32 %v3577_v21, %v3573_v39 }
0x10d9   :  { %v1893_v29 = vpack.c.bf16 %v1892_v26, %v1890_v25  ;;  %v2206_v31 = vpop.permute.xlu1 %2205 }
0x10da   :  { %3304 = vmatmul.mubr.msk.bf16.vlgmr.msra.gmra.mrb[24].mxu0 %vm526_vm1, %v2075_v28 }
0x10db   :  { %3286 = vmatmul.mubr.msk.bf16.vlgmr.msra.gmra.mrb[40].mxu1 %vm578_vm2, %v1893_v29  ;;  %3314 = vmatpush3.bf16.xpose.msra.mxu0 %v2213_v30 }
0x10dc   :  { %3290 = vmatpush3.bf16.xpose.msra.mxu1 %v1950_v23  ;;  %3315 = vmatprep.mubr.msk.bf16.mxu0 %vm3813_vm0, %v3812_v41 }
0x10dd   :  { %3291 = vmatprep.mubr.msk.bf16.mxu1 %vm3813_vm0, %v3812_v41  ;;  %3295 = vmatprep.subr.bf16.mxu1 %v3812_v41 }
0x10de   :  { %3325 = vmatprep.subr.bf16.mxu0 %v3812_v41 }
0x10e2   :  { %3316 = vmatmul.mubr.msk.bf16.vlgmr.msra.gmra.mrb[28].mxu0 %vm526_vm1, %v2206_v31 }
0x10e3   :  { %3292 = vmatmul.mubr.msk.bf16.vlgmr.msra.gmra.mrb[44].mxu1 %vm526_vm1, %v1942_v15  ;;  %3341 = vmatprep.mubr.msk.bf16.mxu0 %vm3813_vm0, %v3812_v41 }
0x10e4   :  { %3297 = vmatprep.mubr.msk.bf16.mxu1 %vm3813_vm0, %v3812_v41 }
0x11ad   :  { %v2118_v32 = vpop.f32.mrb[24].mxu0 }
0x11ae   :  { %v1931_v24 = vpop.f32.mrb[40].mxu1  ;;  %v3305_v34 = vpop.f32.mrb[25].mxu0  ;;  %v2125_v48 = vmul.f32 0.17677669, %v2118_v32 }
0x11af   :  { %v3287_v35 = vpop.f32.mrb[41].mxu1  ;;  %v2121_v33 = vpop.f32.mrb[26].mxu0 }
0x11b0   :  { %v1934_v36 = vpop.f32.mrb[42].mxu1  ;;  %v3306_v37 = vpop.f32.mrb[27].mxu0  ;;  %v2126_v60 = vmul.f32 0.17677669, %v2121_v33  ;;  %v2127_v1 = vadd.f32 %v3610_v58, %v2125_v48 }
0x11b1   :  { %v1938_v38 = vpack.c.bf16 %v1934_v36, %v1931_v24  ;;  %v3288_v43 = vpop.f32.mrb[43].mxu1 }
0x11b2   :  { %v2129_v5 = vsel %vm578_vm2, %v2127_v1, -inf  ;;  %v2128_v6 = vadd.f32 %v3611_v62, %v2126_v60 }
0x11b3   :  { %1939 = vst.msk [vmem:[#allocation2] sm:$0xff] %vm526_vm1, %v1938_v38 }
0x11b4   :  { %v2132_v8 = vsel %vm578_vm2, %v2128_v6, -inf }
0x11b5   :  { %v2249_v45 = vpop.f32.mrb[28].mxu0 }
0x11b6   :  { %v1986_v46 = vpop.f32.mrb[44].mxu1  ;;  %v3317_v47 = vpop.f32.mrb[29].mxu0  ;;  %v2256_v55 = vmul.f32 0.17677669, %v2249_v45 }
0x11b7   :  { %v1993_v49 = vmul.f32 0.17677669, %v1986_v46  ;;  %v3293_v50 = vpop.f32.mrb[45].mxu1  ;;  %v2252_v51 = vpop.f32.mrb[30].mxu0 }
0x11b8   :  { %v1989_v53 = vpop.f32.mrb[46].mxu1  ;;  %v3318_v54 = vpop.f32.mrb[31].mxu0  ;;  %v2258_v3 = vadd.f32 %v3610_v58, %v2256_v55  ;;  %v2257_v4 = vmul.f32 0.17677669, %v2252_v51 }
0x11b9   :  { %v1994_v56 = vmul.f32 0.17677669, %v1989_v53  ;;  %v3294_v57 = vpop.f32.mrb[47].mxu1  ;;  %v1995_v59 = vadd.f32 %v3610_v58, %v1993_v49 }
0x11ba   :  { %v2260_v7 = vsel %vm578_vm2, %v2258_v3, -inf  ;;  %v2259_v9 = vadd.f32 %v3611_v62, %v2257_v4 }
0x11bb   :  { %v1997_v61 = vsel %vm578_vm2, %v1995_v59, -inf  ;;  %v1996_v63 = vadd.f32 %v3611_v62, %v1994_v56 }
0x11bc   :  { %1998 = vmax.xlane.f32.xlu0 %v1997_v61  ;;  %v2263_v10 = vsel %vm578_vm2, %v2259_v9, -inf }
0x11bd   :  { %v2000_v2 = vsel %vm578_vm2, %v1996_v63, -inf }
0x11be   :  { %2001 = vmax.xlane.f32.xlu1 %v2000_v2 }
0x11c0   :  { %2130 = vmax.xlane.f32.xlu0 %v2129_v5 }
0x11c2   :  { %2261 = vmax.xlane.f32.xlu1 %v2260_v7 }
0x11c4   :  { %2133 = vmax.xlane.f32.xlu0 %v2132_v8  ;;  %v3478_v8 = vld [vmem:[#allocation11 + $0x40] sm:$0xff]  }
0x11c5   :  { %3326 = vmatpush3.bf16.msra.mxu0 %v3478_v8  ;;  %v3514_v8 = vld [vmem:[#allocation14 + $0xd0] sm:$0xff]  }
0x11c6   :  { %3327 = vmatprep.subr.bf16.mxu0 %v3812_v41 }
0x11c8   :  { %2264 = vmax.xlane.f32.xlu0 %v2263_v10  ;;  %v3480_v10 = vld [vmem:[#allocation11 + $0x50] sm:$0xff]  }
0x1249   :  { %v1999_v11 = vpop.xlane.xlu0 %1998 }
0x124a   :  { %v2003_v13 = vsub.f32 %v1995_v59, %v1999_v11  ;;  %v3481_v11 = vld [vmem:[#allocation11 + $0x58] sm:$0xff]  }
0x124b   :  { %v2002_v39 = vpop.xlane.xlu1 %2001 }
0x124c   :  { %v2004_v15 = vsub.f32 %v1996_v63, %v2002_v39  ;;  %v2005_v26 = vmul.f32 1.442695, %v2003_v13  ;;  %v3483_v13 = vld [vmem:[#allocation11 + $0x68] sm:$0xff]  }
0x124d   :  { %v2131_v12 = vpop.xlane.xlu0 %2130 }
0x124e   :  { %v2135_v44 = vsub.f32 %v2127_v1, %v2131_v12  ;;  %v2007_v27 = vmul.f32 1.442695, %v2004_v15  ;;  %v3482_v12 = vld [vmem:[#allocation11 + $0x60] sm:$0xff]  }
0x124f   :  { %v2262_v14 = vpop.xlane.xlu1 %2261 }
0x1250   :  { %v2137_v16 = vmul.f32 1.442695, %v2135_v44  ;;  %v2266_v17 = vsub.f32 %v2258_v3, %v2262_v14 }
0x1251   :  { %v2134_v18 = vpop.xlane.xlu0 %2133 }
0x1252   :  { %3578 = vpow2.f32 %v2137_v16  ;;  %v2268_v21 = vmul.f32 1.442695, %v2266_v17  ;;  %v2136_v25 = vsub.f32 %v2128_v6, %v2134_v18  ;;  %v3484_v17 = vld [vmem:[#allocation11 + $0x70] sm:$0xff]  }
0x1254   :  { %3580 = vpow2.f32 %v2268_v21  ;;  %v2139_v28 = vmul.f32 1.442695, %v2136_v25  ;;  %v3485_v25 = vld [vmem:[#allocation11 + $0x78] sm:$0xff]  }
0x1255   :  { %v2265_v29 = vpop.xlane.xlu0 %2264 }
0x1256   :  { %3582 = vpow2.f32 %v2139_v28  ;;  %v2267_v30 = vsub.f32 %v2259_v9, %v2265_v29  ;;  %v3479_v9 = vld [vmem:[#allocation11 + $0x48] sm:$0xff]  }
0x1257   :  { %3584 = vpow2.f32 %v2005_v26  ;;  %3328 = vmatpush3.bf16.msra.mxu0 %v3479_v9  ;;  %v3515_v9 = vld [vmem:[#allocation14 + $0x90] sm:$0xff]  }
0x1258   :  { %3586 = vpow2.f32 %v2007_v27  ;;  %v2270_v23 = vmul.f32 1.442695, %v2267_v30  ;;  %3329 = vmatprep.subr.bf16.mxu0 %v3812_v41 }
0x125a   :  { %3588 = vpow2.f32 %v2270_v23 }
0x125b   :  { %3330 = vmatpush3.bf16.msra.mxu0 %v3480_v10  ;;  %v3516_v10 = vld [vmem:[#allocation14 + $0xd8] sm:$0xff]  }
0x125c   :  { %v3579_v31 = vpop.eup %3578  ;;  %3331 = vmatprep.subr.bf16.mxu0 %v3812_v41 }
0x125d   :  { %v2141_v32 = vsel %vm578_vm2, %v3579_v31, 0.0 }
0x125e   :  { %v3581_v24 = vpop.eup %3580  ;;  %2142 = vadd.xlane.f32.xlu1 %v2141_v32 }
0x125f   :  { %v2272_v36 = vsel %vm578_vm2, %v3581_v24, 0.0  ;;  %3332 = vmatpush3.bf16.msra.mxu0 %v3481_v11  ;;  %v3517_v11 = vld [vmem:[#allocation14 + $0x98] sm:$0xff]  }
0x1260   :  { %v3583_v34 = vpop.eup %3582  ;;  %3333 = vmatprep.subr.bf16.mxu0 %v3812_v41 }
0x1261   :  { %v3585_v35 = vpop.eup %3584  ;;  %v2144_v33 = vsel %vm578_vm2, %v3583_v34, 0.0 }
0x1262   :  { %v3587_v37 = vpop.eup %3586  ;;  %2145 = vadd.xlane.f32.xlu0 %v2144_v33  ;;  %2273 = vadd.xlane.f32.xlu1 %v2272_v36  ;;  %v2009_v43 = vsel %vm578_vm2, %v3585_v35, 0.0 }
0x1263   :  { %v2012_v38 = vsel %vm578_vm2, %v3587_v37, 0.0  ;;  %3334 = vmatpush3.bf16.msra.mxu0 %v3482_v12  ;;  %v3519_v12 = vld [vmem:[#allocation14 + $0xa0] sm:$0xff]  }
0x1264   :  { %v3589_v45 = vpop.eup %3588  ;;  %3335 = vmatprep.subr.bf16.mxu0 %v3812_v41 }
0x1265   :  { %v2275_v46 = vsel %vm578_vm2, %v3589_v45, 0.0 }
0x1266   :  { %2013 = vadd.xlane.f32.xlu0 %v2012_v38  ;;  %2010 = vadd.xlane.f32.xlu1 %v2009_v43 }
0x1267   :  { %3336 = vmatpush3.bf16.msra.mxu0 %v3483_v13 }
0x1268   :  { %3337 = vmatprep.subr.bf16.mxu0 %v3812_v41 }
0x126a   :  { %2276 = vadd.xlane.f32.xlu0 %v2275_v46  ;;  %v3488_v46 = vld [vmem:[#allocation12 + $0x84] ss:$8 sps:$4 sm:$0xff]  }
0x126b   :  { %3338 = vmatpush3.bf16.msra.mxu0 %v3484_v17 }
0x126c   :  { %3339 = vmatprep.subr.bf16.mxu0 %v3812_v41 }
0x126f   :  { %3340 = vmatpush3.bf16.msra.mxu0 %v3485_v25  ;;  %v3016_v25 = vld [vmem:[%s4373_s9 + $0x1] ss:$0 sm:$0xff] }
0x1277   :  { %2021 = vrot.lane.b32.xlu1 %v4233_v52, %s3814_s30 }
0x127b   :  { %2283 = vrot.lane.b32.xlu1 %v4233_v52, %s3815_s7 }
0x1280   :  { %2152 = vrot.lane.b32.xlu0 %v4233_v52, %s3808_s6 }
0x12eb   :  { %v2143_v47 = vpop.xlane.xlu1 %2142 }
0x12ef   :  { %v2146_v48 = vpop.xlane.xlu0 %2145  ;;  %v2274_v49 = vpop.xlane.xlu1 %2273 }
0x12f3   :  { %v2014_v50 = vpop.xlane.xlu0 %2013  ;;  %v2011_v51 = vpop.xlane.xlu1 %2010 }
0x12f4   :  { %3590 = vrcp.f32 %v2014_v50 }
0x12f5   :  { %3592 = vrcp.f32 %v2011_v51 }
0x12f6   :  { %3594 = vrcp.f32 %v2146_v48  ;;  %v3489_v48 = vld [vmem:[#allocation12 + $0x90] ss:$8 sps:$4 sm:$0xff]  }
0x12f7   :  { %v2022_v53 = vpop.permute.xlu1 %2021  ;;  %3596 = vrcp.f32 %v2143_v47  ;;  %v2277_v55 = vpop.xlane.xlu0 %2276  ;;  %v3491_v47 = vld [vmem:[#allocation12 + $0x94] ss:$8 sps:$4 sm:$0xff]  }
0x12f8   :  { %3296 = vmatpush3.bf16.msra.mxu1 %v2022_v53  ;;  %3598 = vrcp.f32 %v2277_v55 }
0x12f9   :  { %3307 = vmatprep.subr.bf16.mxu1 %v3812_v41  ;;  %3600 = vrcp.f32 %v2274_v49 }
0x12fb   :  { %v2153_v60 = vpop.permute.xlu0 %2152  ;;  %v2284_v3 = vpop.permute.xlu1 %2283 }
0x12fe   :  { %v3591_v54 = vpop.eup %3590 }
0x12ff   :  { %v3593_v56 = vpop.eup %3592  ;;  %v2018_v57 = vmul.f32 %v3591_v54, %v3587_v37 }
0x1300   :  { %v2016_v58 = vmul.f32 %v3593_v56, %v3585_v35  ;;  %v3595_v59 = vpop.eup %3594  ;;  %v3494_v56 = vld [vmem:[#allocation12 + $0xa4] ss:$8 sps:$4 sm:$0xff]  }
0x1301   :  { %v3597_v61 = vpop.eup %3596  ;;  %v2150_v62 = vmul.f32 %v3595_v59, %v3583_v34  ;;  %v3500_v59 = vld [vmem:[#allocation12 + $0xc4] ss:$8 sps:$4 sm:$0xff]  }
0x1302   :  { %v2019_v52 = vpack.c.bf16 %v2018_v57, %v2016_v58  ;;  %v2148_v63 = vmul.f32 %v3597_v61, %v3579_v31  ;;  %v3599_v2 = vpop.eup %3598  ;;  %v3492_v57 = vld [vmem:[#allocation12 + $0xa0] ss:$8 sps:$4 sm:$0xff]   ;;  %v3497_v58 = vld [vmem:[#allocation12 + $0xb4] ss:$8 sps:$4 sm:$0xff]  }
0x1303   :  { %v3601_v4 = vpop.eup %3600  ;;  %v2281_v5 = vmul.f32 %v3599_v2, %v3589_v45  ;;  %v3486_v45 = vld [vmem:[#allocation12 + $0x80] ss:$8 sps:$4 sm:$0xff]   ;;  %v3503_v61 = vld [vmem:[#allocation12 + $0xd4] ss:$8 sps:$4 sm:$0xff]  }
0x1304   :  { %3298 = vmatmul.mubr.msk.bf16.vlgmr.msra.gmra.mrb[48].mxu1 %vm578_vm2, %v2019_v52  ;;  %v2151_v1 = vpack.c.bf16 %v2150_v62, %v2148_v63  ;;  %v2279_v6 = vmul.f32 %v3601_v4, %v3581_v24  ;;  %v3495_v52 = vld [vmem:[#allocation12 + $0xb0] ss:$8 sps:$4 sm:$0xff]   ;;  %v3506_v63 = vld [vmem:[#allocation12 + $0xe4] ss:$8 sps:$4 sm:$0xff]   ;;  %v3509_v2 = vld [vmem:[#allocation12 + $0xf4] ss:$8 sps:$4 sm:$0xff]  }
0x1305   :  { %3308 = vmatpush3.bf16.msra.mxu1 %v2153_v60  ;;  %3309 = vmatprep.mubr.msk.bf16.mxu1 %vm3813_vm0, %v3812_v41  ;;  %v3498_v60 = vld [vmem:[#allocation12 + $0xc0] ss:$8 sps:$4 sm:$0xff]   ;;  %v3501_v62 = vld [vmem:[#allocation12 + $0xd0] ss:$8 sps:$4 sm:$0xff]  }
0x1306   :  { %3319 = vmatprep.subr.bf16.mxu1 %v3812_v41  ;;  %v2282_v7 = vpack.c.bf16 %v2281_v5, %v2279_v6  ;;  %v3510_v4 = vld [vmem:[#allocation14 + $0xc0] sm:$0xff]   ;;  %v3512_v6 = vld [vmem:[#allocation14 + $0xc8] sm:$0xff]  }
0x1307   :  { %v3511_v5 = vld [vmem:[#allocation14 + $0x80] sm:$0xff]   ;;  %3147 = vmatprep.subr.bf16.mxu0 %v3510_v4 }
0x130c   :  { %3310 = vmatmul.mubr.msk.bf16.vlgmr.msra.gmra.mrb[52].mxu1 %vm578_vm2, %v2151_v1  ;;  %v3504_v1 = vld [vmem:[#allocation12 + $0xe0] ss:$8 sps:$4 sm:$0xff]  }
0x130d   :  { %3320 = vmatpush3.bf16.msra.mxu1 %v2284_v3  ;;  %3321 = vmatprep.mubr.msk.bf16.mxu1 %vm3813_vm0, %v3812_v41  ;;  %v3507_v3 = vld [vmem:[#allocation12 + $0xf0] ss:$8 sps:$4 sm:$0xff]  }
0x130e   :  { %2598 = vmatprep.subr.bf16.mxu1 %v3488_v46 }
0x1314   :  { %3322 = vmatmul.mubr.msk.bf16.vlgmr.msra.gmra.mrb[56].mxu1 %vm578_vm2, %v2282_v7  ;;  %v3513_v7 = vld [vmem:[#allocation14 + $0x88] sm:$0xff]  }
0x1315   :  { %2630 = vmatprep.mubr.bf16.mxu1 %v3811_v0  ;;  %2599 = vmatpush1.bf16.msra.mxu1 %v3486_v45 }
0x1316   :  { %2600 = vmatprep.subr.bf16.mxu1 %v3491_v47 }
0x1319   :  { %2601 = vmatpush1.bf16.msra.mxu1 %v3489_v48 }
0x131a   :  { %2602 = vmatprep.subr.bf16.mxu1 %v3494_v56 }
0x131d   :  { %2603 = vmatpush1.bf16.msra.mxu1 %v3492_v57 }
0x131e   :  { %2604 = vmatprep.subr.bf16.mxu1 %v3497_v58 }
0x1321   :  { %2605 = vmatpush1.bf16.msra.mxu1 %v3495_v52 }
0x1322   :  { %2606 = vmatprep.subr.bf16.mxu1 %v3500_v59 }
0x1325   :  { %2607 = vmatpush1.bf16.msra.mxu1 %v3498_v60 }
0x1326   :  { %2608 = vmatprep.subr.bf16.mxu1 %v3503_v61 }
0x1329   :  { %2609 = vmatpush1.bf16.msra.mxu1 %v3501_v62 }
0x132a   :  { %2610 = vmatprep.subr.bf16.mxu1 %v3506_v63 }
0x132d   :  { %2611 = vmatpush1.bf16.msra.mxu1 %v3504_v1 }
0x132e   :  { %2612 = vmatprep.subr.bf16.mxu1 %v3509_v2 }
0x1331   :  { %2613 = vmatpush1.bf16.msra.mxu1 %v3507_v3 }
0x13d7   :  { %v2061_v39 = vpop.f32.mrb[48].mxu1 }
0x13d8   :  { %v3299_v44 = vpop.f32.mrb[49].mxu1 }
0x13d9   :  { %v2064_v0 = vpop.f32.mrb[50].mxu1  ;;  %v3520_v44 = vld [vmem:[#allocation14 + $0xe8] sm:$0xff]  }
0x13da   :  { %v2068_v14 = vpack.c.bf16 %v2064_v0, %v2061_v39  ;;  %v3300_v15 = vpop.f32.mrb[51].mxu1  ;;  %v3518_v39 = vld [vmem:[#allocation14 + $0xe0] sm:$0xff]  }
0x13dc   :  { %2070 = vrot.lane.b32.xlu1 %v2068_v14, %s3815_s7 }
0x13df   :  { %v2192_v16 = vpop.f32.mrb[52].mxu1 }
0x13e0   :  { %v3311_v18 = vpop.f32.mrb[53].mxu1 }
0x13e1   :  { %v2195_v21 = vpop.f32.mrb[54].mxu1 }
0x13e2   :  { %v2199_v26 = vpack.c.bf16 %v2195_v21, %v2192_v16  ;;  %v3312_v27 = vpop.f32.mrb[55].mxu1 }
0x13e4   :  { %2201 = vrot.lane.b32.xlu0 %v2199_v26, %s3808_s6 }
0x13e7   :  { %v2323_v28 = vpop.f32.mrb[56].mxu1 }
0x13e8   :  { %v3323_v29 = vpop.f32.mrb[57].mxu1 }
0x13e9   :  { %v2326_v30 = vpop.f32.mrb[58].mxu1  ;;  %v3017_v29 = vld [vmem:[%s4374_s10 + $0x1] ss:$0 sm:$0xff] }
0x13ea   :  { %v2330_v23 = vpack.c.bf16 %v2326_v30, %v2323_v28  ;;  %v3324_v31 = vpop.f32.mrb[59].mxu1 }
0x13ec   :  { %2332 = vrot.lane.b32.xlu1 %v2330_v23, %s3814_s30 }
0x144e   :  { %v2071_v32 = vpop.permute.xlu1 %2070 }
0x144f   :  { %2073 = vst.msk [vmem:[#allocation2] sm:$0xff] %vm781_vm3, %v2071_v32 }
0x1456   :  { %v2202_v24 = vpop.permute.xlu0 %2201 }
0x1457   :  { %2204 = vst.msk [vmem:[#allocation2] sm:$0xff] %vm913_vm4, %v2202_v24  ;;  %v3521_v24 = vld [vmem:[#allocation14 + $0xa8] sm:$0xff]  }
0x145e   :  { %v2333_v34 = vpop.permute.xlu1 %2332 }
0x145f   :  { %2335 = vst.msk [vmem:[#allocation2] sm:$0xff] %vm1045_vm5, %v2333_v34  ;;  %v3522_v34 = vld [vmem:[#allocation14 + $0xf0] sm:$0xff]  }
0x1466   :  { %v2336_v41 = vld [vmem:[#allocation2] sm:$0xff] }
0x1467   :  { %3342 = vmatmul.mubr.bf16.vlgmr.msra.gmra.mrb[32].mxu0 %v2336_v41  ;;  %v3523_v41 = vld [vmem:[#allocation14 + $0xb0] sm:$0xff]  }
0x1468   :  { %3148 = vmatpush3.bf16.msra.mxu0 %v3511_v5 }
0x1469   :  { %3149 = vmatprep.subr.bf16.mxu0 %v3512_v6 }
0x146c   :  { %3150 = vmatpush3.bf16.msra.mxu0 %v3513_v7 }
0x146d   :  { %3151 = vmatprep.subr.bf16.mxu0 %v3514_v8 }
0x1470   :  { %3152 = vmatpush3.bf16.msra.mxu0 %v3515_v9 }
0x1471   :  { %3153 = vmatprep.subr.bf16.mxu0 %v3516_v10 }
0x1474   :  { %3154 = vmatpush3.bf16.msra.mxu0 %v3517_v11 }
0x1475   :  { %3155 = vmatprep.subr.bf16.mxu0 %v3518_v39 }
0x1478   :  { %3156 = vmatpush3.bf16.msra.mxu0 %v3519_v12 }
0x1479   :  { %3157 = vmatprep.subr.bf16.mxu0 %v3520_v44 }
0x147c   :  { %3158 = vmatpush3.bf16.msra.mxu0 %v3521_v24 }
0x147d   :  { %3159 = vmatprep.subr.bf16.mxu0 %v3522_v34 }
0x1480   :  { %3160 = vmatpush3.bf16.msra.mxu0 %v3523_v41 }
0x153a   :  { %v2436_v35 = vpop.f32.mrb[32].mxu0 }
0x153b   :  { %v2443_v33 = vadd.f32 %v2436_v35, %v4223_v40  ;;  %v3343_v36 = vpop.f32.mrb[33].mxu0  ;;  %v3524_v35 = vld [vmem:[#allocation14 + $0xf8] sm:$0xff]  }
0x153c   :  { %v2439_v37 = vpop.f32.mrb[34].mxu0  ;;  %3161 = vmatprep.subr.bf16.mxu0 %v3524_v35  ;;  %v3018_v36 = vld [vmem:[%s4376_s12 + $0x2] sm:$0x3] }
0x153d   :  { %v2444_v38 = vadd.f32 %v2439_v37, %v4225_v42  ;;  %2449 = vadd.xlane.f32.xlu0 %v2443_v33  ;;  %v3344_v43 = vpop.f32.mrb[35].mxu0  ;;  %v2511_v37 = vrot.slane %v3018_v36, %v1216_v20 }
0x153f   :  { %2451 = vadd.xlane.f32.xlu1 %v2444_v38 }
0x15ca   :  { %v2450_v49 = vpop.xlane.xlu0 %2449 }
0x15cb   :  { %v2453_v50 = vmul.f32 0.0078125, %v2450_v49 }
0x15cc   :  { %v2452_v51 = vpop.xlane.xlu1 %2451 }
0x15cd   :  { %v2455_v53 = vsub.f32 %v2443_v33, %v2453_v50  ;;  %v2454_v40 = vmul.f32 0.0078125, %v2452_v51  ;;  %v3525_v33 = vld [vmem:[#allocation14 + $0xb8] sm:$0xff]  }
0x15ce   :  { %3162 = vmatpush3.bf16.msra.mxu0 %v3525_v33 }
0x15cf   :  { %v4322_v54 = vsub.f32 %v2444_v38, %v2454_v40  ;;  %v2457_v55 = vmul.f32 %v2455_v53, %v2455_v53  ;;  %v2515_v38 = vrot.slane %v3018_v36, %v1220_v22 }
0x15d1   :  { %2459 = vadd.xlane.f32.xlu0 %v2457_v55  ;;  %v2458_v42 = vmul.f32 %v4322_v54, %v4322_v54 }
0x15d5   :  { %2461 = vadd.xlane.f32.xlu0 %v2458_v42 }
0x165e   :  { %v2460_v0 = vpop.xlane.xlu0 %2459 }
0x165f   :  { %v2463_v13 = vmul.f32 0.0078125, %v2460_v0 }
0x1661   :  { %v2465_v14 = vadd.f32 1e-06, %v2463_v13  ;;  %v3055_v13 = vld [vmem:[%s4379_s15 + $0x1] ss:$0 sm:$0xff] }
0x1662   :  { %v2462_v15 = vpop.xlane.xlu0 %2461 }
0x1663   :  { %3602 = vrsqrt.f32 %v2465_v14  ;;  %v2464_v16 = vmul.f32 0.0078125, %v2462_v15 }
0x1665   :  { %v2466_v17 = vadd.f32 1e-06, %v2464_v16  ;;  %v3056_v16 = vld [vmem:[%s4380_s16 + $0x1] ss:$0 sm:$0xff] }
0x1667   :  { %3604 = vrsqrt.f32 %v2466_v17 }
0x166d   :  { %v3603_v18 = vpop.eup %3602 }
0x166e   :  { %v2469_v21 = vmul.f32 %v3603_v18, %v2455_v53 }
0x1670   :  { %v2477_v28 = vmul.f32 %v3016_v25, %v2469_v21 }
0x1671   :  { %v3605_v26 = vpop.eup %3604 }
0x1672   :  { %v2470_v27 = vmul.f32 %v3605_v26, %v4322_v54  ;;  %v2485_v23 = vadd.f32 %v3017_v29, %v2477_v28 }
0x1674   :  { %v2478_v30 = vmul.f32 %v3016_v25, %v2470_v27 }
0x1676   :  { %v2486_v31 = vadd.f32 %v3017_v29, %v2478_v30 }
0x1678   :  { %v2487_v32 = vpack.c.bf16 %v2486_v31, %v2485_v23 }
0x167a   :  { %2631 = vmatmul.mubr.bf16.vlgmr.msra.gmra.mrb[60].mxu1 %v2487_v32 }
0x174d   :  { %v2632_v43 = vpop.f32.mrb[60].mxu1 }
0x174e   :  { %v2633_v45 = vadd.f32 %v2632_v43, %v2511_v37  ;;  %v2634_v46 = vpop.f32.mrb[61].mxu1 }
0x174f   :  { %v2635_v47 = vadd.f32 %v2634_v46, %v2515_v38  ;;  %v2636_v48 = vpop.f32.mrb[62].mxu1 }
0x1750   :  { %v2637_v49 = vadd.f32 %v2636_v48, %v2511_v37  ;;  %v2638_v50 = vpop.f32.mrb[63].mxu1  ;;  %v2641_v53 = vmax.f32 %v2633_v45, 0.0 }
0x1751   :  { %v2639_v51 = vadd.f32 %v2638_v50, %v2515_v38  ;;  %v2642_v54 = vmax.f32 %v2635_v47, 0.0 }
0x1752   :  { %v2643_v40 = vmax.f32 %v2637_v49, 0.0 }
0x1753   :  { %v2644_v55 = vmax.f32 %v2639_v51, 0.0 }
0x1754   :  { %v2645_v42 = vpack.c.bf16 %v2643_v40, %v2641_v53 }
0x1755   :  { %v2646_v56 = vpack.c.bf16 %v2644_v55, %v2642_v54 }
0x1757   :  { %2816 = vmatprep.mubr.bf16.mxu0 %v2646_v56 }
0x1758   :  { %2817 = vmatmul.mubr.bf16.vlgmr.msra.gmra.mrb[36].mxu0 %v2645_v42 }
0x182b   :  { %v3163_v20 = vpop.f32.mrb[36].mxu0 }
0x182c   :  { %v3164_v22 = vpop.f32.mrb[37].mxu0 }
0x182d   :  { %v3165_v57 = vadd.f32 %v3164_v22, %v3163_v20  ;;  %v3166_v58 = vpop.f32.mrb[38].mxu0 }
0x182e   :  { %v3167_v52 = vpop.f32.mrb[39].mxu0 }
0x182f   :  { %v2819_v59 = vadd.f32 %v3165_v57, %v3036_v19  ;;  %v3168_v60 = vadd.f32 %v3167_v52, %v3166_v58 }
0x1831   :  { %v2822_v61 = vadd.f32 %v3168_v60, %v3036_v19  ;;  %v2825_v62 = vadd.f32 %v2819_v59, %v2485_v23 }
0x1833   :  { %2831 = vadd.xlane.f32.xlu1 %v2825_v62  ;;  %v2826_v63 = vadd.f32 %v2822_v61, %v2486_v31 }
0x1835   :  { %2833 = vadd.xlane.f32.xlu0 %v2826_v63 }
0x18c0   :  { %v2832_v1 = vpop.xlane.xlu1 %2831 }
0x18c1   :  { %v2835_v2 = vmul.f32 0.0078125, %v2832_v1 }
0x18c2   :  { %v2834_v3 = vpop.xlane.xlu0 %2833 }
0x18c3   :  { %v2837_v4 = vsub.f32 %v2825_v62, %v2835_v2  ;;  %v2836_v5 = vmul.f32 0.0078125, %v2834_v3 }
0x18c5   :  { %v2838_v6 = vsub.f32 %v2826_v63, %v2836_v5  ;;  %v2839_v7 = vmul.f32 %v2837_v4, %v2837_v4 }
0x18c7   :  { %2841 = vadd.xlane.f32.xlu1 %v2839_v7  ;;  %v2840_v8 = vmul.f32 %v2838_v6, %v2838_v6 }
0x18c9   :  { %2843 = vadd.xlane.f32.xlu0 %v2840_v8 }
0x1954   :  { %v2842_v9 = vpop.xlane.xlu1 %2841 }
0x1955   :  { %v2845_v10 = vmul.f32 0.0078125, %v2842_v9 }
0x1956   :  { %v2844_v11 = vpop.xlane.xlu0 %2843 }
0x1957   :  { %v2847_v39 = vadd.f32 1e-06, %v2845_v10  ;;  %v2846_v12 = vmul.f32 0.0078125, %v2844_v11 }
0x1959   :  { %3606 = vrsqrt.f32 %v2847_v39  ;;  %v2848_v44 = vadd.f32 1e-06, %v2846_v12 }
0x195b   :  { %3608 = vrsqrt.f32 %v2848_v44 }
0x1963   :  { %v3607_v0 = vpop.eup %3606 }
0x1964   :  { %v2851_v14 = vmul.f32 %v3607_v0, %v2837_v4 }
0x1965   :  { %v3609_v15 = vpop.eup %3608 }
0x1966   :  { %v2852_v17 = vmul.f32 %v3609_v15, %v2838_v6  ;;  %v2859_v18 = vmul.f32 %v3055_v13, %v2851_v14 }
0x1968   :  { %v2860_v21 = vmul.f32 %v3055_v13, %v2852_v17  ;;  %v2867_v25 = vadd.f32 %v3056_v16, %v2859_v18 }
0x196a   :  { %v2868_v26 = vadd.f32 %v3056_v16, %v2860_v21  ;;  %2869 = vst [vmem:[#allocation15] sm:$0xff] %v2867_v25 }
0x196c   :  { %2870 = vst [vmem:[#allocation15 + $0x8] sm:$0xff] %v2868_v26 }
0x196d   :  { %3777 = shalt.err (!%p3774_p4)
}
0x196e   :  { %s3778_s16 = scalar_lea.hbm %s4381_s17, 256 }
0x196f   :  { %p3779_p5 = scmp.ne.s32.totalorder %s4381_s17, %s3778_s16  ;;  %p3782_p6 = scmp.lt.u32.totalorder %s3778_s16, %s4381_s17 }
0x1971   :  { %p3784_p7 = pnand %p3782_p6, %p3779_p5 }
0x1973   :  { %3787 = shalt.err (!%p3784_p7)
}
0x1974   :  { %2882 = dma.vmem_to_hbm [thread:$0]  %s2877_s1, 256, %s4381_s17, [#allocation5], %s3804_s27, %s3804_s27, %s3805_s3  }
0x1975   :  { %3796 = dma.done.wait [#allocation5], 256  }
0x1976   :  { %3797 = vsyncadd [#allocation5], 4294967040 }
0x1977   :  { %2886 = vsyncpa [#allocation4], 1 }
0x1978   :  { %2887 = vsyncpa [#allocation7], 1 }
0x1979   :  { %2888 = vsyncpa [#allocation10], 1 }
0x197a   :  { %2889 = vsyncpa [#allocation13], 1 }
0x197b   :  { %2890 = vsyncpa [#allocation5], 1 }

</bundles_post_ra>
